<compile_context>
chip_gen: v7x
topology: tpu7x:2x2x1
jax: 0.10.0
libtpu: 0.0.40
codegen_flags: <defaults>
</compile_context>

<pallas_src>
import functools

import jax
import jax.numpy as jnp
from jax.experimental import pallas as pl
from jax.experimental.pallas import tpu as pltpu


# ----------------------------------------------------------------------------
# Fused kernel: (p - r | q) selection + 3-layer FFN
# ----------------------------------------------------------------------------
def _fused_ffn_kernel(p_ref, r_ref, q_ref,
                      w1_ref, b1_ref, w2_ref, b2_ref, w3_ref, b3_ref,
                      o_ref, *, num_atom_tiles):
    i = pl.program_id(0)
    is_atom = i < num_atom_tiles                       # scalar predicate

    # Atom tiles use diff = p - r (f32 subtract: no bf16 cancellation);
    # query tiles use q.  Cast to bf16 only for the MXU matmul.
    x = jnp.where(is_atom, p_ref[...] - r_ref[...], q_ref[...])
    x = x.astype(jnp.bfloat16)

    # Layer 1: bf16 matmul, f32 accumulate, f32 bias + ReLU.
    h1 = jnp.dot(x, w1_ref[...], preferred_element_type=jnp.float32) + b1_ref[...]
    h1 = jnp.maximum(h1, 0.0).astype(jnp.bfloat16)

    # Layer 2.
    h2 = jnp.dot(h1, w2_ref[...], preferred_element_type=jnp.float32) + b2_ref[...]
    h2 = jnp.maximum(h2, 0.0).astype(jnp.bfloat16)

    # Layer 3: narrow (task_num-wide) output; masked store is fine here.
    out = jnp.dot(h2, w3_ref[...], preferred_element_type=jnp.float32) + b3_ref[...]
    o_ref[...] = out.astype(o_ref.dtype)


# ----------------------------------------------------------------------------
# One-time weight packing (call OUTSIDE the jit-ed forward)
# ----------------------------------------------------------------------------
def pack_ffn_params(ffn_params):
    """bf16 weights, f32 biases; ffn-hidden dim zero-padded to a multiple of
    128 (zero-padding is numerically exact for Linear->ReLU->Linear chains)."""
    w1, b1, w2, b2, w3, b3 = ffn_params
    f = w1.shape[1]
    f_pad = ((f + 127) // 128) * 128

    def pad_cols(a, cols):
        return jnp.pad(a, ((0, 0), (0, cols - a.shape[1])))

    def pad_rows(a, rows):
        return jnp.pad(a, ((0, rows - a.shape[0]), (0, 0)))

    w1p = pad_cols(w1, f_pad).astype(jnp.bfloat16)
    b1p = pad_cols(b1.reshape(1, -1), f_pad).astype(jnp.float32)
    w2p = pad_cols(pad_rows(w2, f_pad), f_pad).astype(jnp.bfloat16)
    b2p = pad_cols(b2.reshape(1, -1), f_pad).astype(jnp.float32)
    w3p = pad_rows(w3, f_pad).astype(jnp.bfloat16)
    b3p = b3.reshape(1, -1).astype(jnp.float32)
    return (w1p, b1p, w2p, b2p, w3p, b3p)


# ----------------------------------------------------------------------------
# Model wrapper: single pallas_call over [atom tiles ; query tiles]
# ----------------------------------------------------------------------------
def reaction_model_bimol_forward(r_feat, p_feat, q_feat, packed_params,
                                 *, tile_rows=512):
    """Fused forward: concat([diff_enc(p - r), q]) -> FFN (no_softplus)."""
    w1, b1, w2, b2, w3, b3 = packed_params
    h = p_feat.shape[1]
    f = w1.shape[1]
    t = w3.shape[1]

    n_atoms = p_feat.shape[0]
    n_q = q_feat.shape[0]

    def ensure_rows(a):      # guard n_atoms == 0 / n_q == 0 edge cases
        return a if a.shape[0] > 0 else jnp.zeros((1, a.shape[1]), a.dtype)

    p_in = ensure_rows(p_feat.astype(jnp.float32))
    r_in = ensure_rows(r_feat.astype(jnp.float32))
    q_in = ensure_rows(q_feat.astype(jnp.float32))

    num_atom_tiles = pl.cdiv(p_in.shape[0], tile_rows)
    num_q_tiles = pl.cdiv(q_in.shape[0], tile_rows)
    total_tiles = num_atom_tiles + num_q_tiles
    atom_rows_pad = num_atom_tiles * tile_rows
    q_rows_pad = num_q_tiles * tile_rows

    na_clamp = max(num_atom_tiles - 1, 0)
    nq_clamp = max(num_q_tiles - 1, 0)

    atom_map = lambda i: (jnp.minimum(i, na_clamp), 0)                 # clamped on q steps
    query_map = lambda i: (jnp.minimum(jnp.maximum(i - num_atom_tiles, 0), nq_clamp), 0)
    const = lambda i: (0, 0)

    out = pl.pallas_call(
        functools.partial(_fused_ffn_kernel, num_atom_tiles=num_atom_tiles),
        out_shape=jax.ShapeDtypeStruct((atom_rows_pad + q_rows_pad, t),
                                       jnp.float32),
        grid_spec=pltpu.PrefetchScalarGridSpec(
            num_scalar_prefetch=0,
            grid=(total_tiles,),
            in_specs=[
                pl.BlockSpec((tile_rows, h), atom_map),    # p (f32, partial last tile)
                pl.BlockSpec((tile_rows, h), atom_map),    # r (f32)
                pl.BlockSpec((tile_rows, h), query_map),   # q (f32)
                pl.BlockSpec((h, f), const),               # w1 (bf16)
                pl.BlockSpec((1, f), const),               # b1 (f32)
                pl.BlockSpec((f, f), const),               # w2 (bf16)
                pl.BlockSpec((1, f), const),               # b2 (f32)
                pl.BlockSpec((f, t), const),               # w3 (bf16, narrow out)
                pl.BlockSpec((1, t), const),               # b3 (f32)
            ],
            out_specs=pl.BlockSpec((tile_rows, t), lambda i: (i, 0)),
        ),
        compiler_params=pltpu.CompilerParams(
            dimension_semantics=("parallel",)),
    )(p_in, r_in, q_in, w1, b1, w2, b2, w3, b3)

    # Strip padded rows, restore [diff_rows ; query_rows] order.
    out_atoms = out[:n_atoms]
    out_q = out[atom_rows_pad:atom_rows_pad + n_q]
    result = jnp.concatenate([out_atoms, out_q], axis=0)
    # .squeeze(-1): no-op for task_num > 1 (kept for semantic fidelity).
    return jnp.squeeze(result, axis=-1) if t == 1 else result


def init_ffn_params(key, hidden, ffn_hidden, task_num):
    """Deterministic init. Weight layout: (in, out)."""
    k1, k2, k3, k4, k5, k6 = jax.random.split(key, 6)
    scale = 0.1
    w1 = scale * jax.random.normal(k1, (hidden, ffn_hidden), jnp.float32)
    b1 = scale * jax.random.normal(k4, (1, ffn_hidden), jnp.float32)
    w2 = scale * jax.random.normal(k2, (ffn_hidden, ffn_hidden), jnp.float32)
    b2 = scale * jax.random.normal(k5, (1, ffn_hidden), jnp.float32)
    w3 = scale * jax.random.normal(k3, (ffn_hidden, task_num), jnp.float32)
    b3 = scale * jax.random.normal(k6, (1, task_num), jnp.float32)
    return (w1, b1, w2, b2, w3, b3)


if __name__ == "__main__":
    # Small shapes consistent with the module (hidden sizes scaled from 300,
    # kept 128-aligned; ragged row counts exercise partial-tile handling).
    HIDDEN = 128        # mpnn_hidden_size == mpnn_diff_hidden_size
    FFN_HIDDEN = 128    # ffn_hidden_size
    TASK_NUM = 2
    N_ATOMS = 13        # rows of per-atom reactant/product features (ragged)
    N_QUERY = 7         # rows of query molecule features (ragged)

    key = jax.random.PRNGKey(0)
    kr, kp, kq, kw = jax.random.split(key, 4)
    r_feat = jax.random.normal(kr, (N_ATOMS, HIDDEN), jnp.float32)
    p_feat = jax.random.normal(kp, (N_ATOMS, HIDDEN), jnp.float32)
    q_feat = jax.random.normal(kq, (N_QUERY, HIDDEN), jnp.float32)

    ffn_params = init_ffn_params(kw, HIDDEN, FFN_HIDDEN, TASK_NUM)
    packed_params = pack_ffn_params(ffn_params)   # once, outside the forward

    out = reaction_model_bimol_forward(r_feat, p_feat, q_feat, packed_params)
    out = jax.block_until_ready(out)

    # Pure-JAX reference with matching semantics:
    # f32 diff, bf16 matmul inputs, f32 accumulate/bias/ReLU.
    w1, b1, w2, b2, w3, b3 = ffn_params
    bf = jnp.bfloat16
    x_ref = jnp.concatenate([p_feat - r_feat, q_feat], axis=0).astype(bf)
    h1 = jnp.maximum(
        jnp.dot(x_ref, w1.astype(bf), preferred_element_type=jnp.float32) + b1,
        0.0).astype(bf)
    h2 = jnp.maximum(
        jnp.dot(h1, w2.astype(bf), preferred_element_type=jnp.float32) + b2,
        0.0).astype(bf)
    ref = jnp.dot(h2, w3.astype(bf), preferred_element_type=jnp.float32) + b3

    assert out.shape == (N_ATOMS + N_QUERY, TASK_NUM)
    assert jnp.allclose(out, ref, atol=2e-3, rtol=2e-3)

    print("KERNEL_OK")
</pallas_src>

<mosaic_0001>
module attributes {stable_mosaic.version = 11 : i64} {
  func.func @_fused_ffn_kernel(%arg0: i32, %arg1: memref<512x128xf32, #tpu.memory_space<vmem>>, %arg2: memref<512x128xf32, #tpu.memory_space<vmem>>, %arg3: memref<512x128xf32, #tpu.memory_space<vmem>>, %arg4: memref<128x128xbf16, #tpu.memory_space<vmem>>, %arg5: memref<1x128xf32, #tpu.memory_space<vmem>>, %arg6: memref<128x128xbf16, #tpu.memory_space<vmem>>, %arg7: memref<1x128xf32, #tpu.memory_space<vmem>>, %arg8: memref<128x2xbf16, #tpu.memory_space<vmem>>, %arg9: memref<1x2xf32, #tpu.memory_space<vmem>>, %arg10: memref<512x2xf32, #tpu.memory_space<vmem>>) attributes {dimension_semantics = [#tpu.dimension_semantics<parallel>], iteration_bounds = array<i64: 2>, scalar_prefetch = 0 : i64, scratch_operands = 0 : i64, tpu.core_type = #tpu.core_type<tc>, window_params = [{transform_indices = @transform_0, window_bounds = array<i64: 512, 128>}, {transform_indices = @transform_1, window_bounds = array<i64: 512, 128>}, {transform_indices = @transform_2, window_bounds = array<i64: 512, 128>}, {pipeline_mode = #tpu.pipeline_mode<synchronous>, transform_indices = @transform_3, window_bounds = array<i64: 128, 128>}, {pipeline_mode = #tpu.pipeline_mode<synchronous>, transform_indices = @transform_4, window_bounds = array<i64: 1, 128>}, {pipeline_mode = #tpu.pipeline_mode<synchronous>, transform_indices = @transform_5, window_bounds = array<i64: 128, 128>}, {pipeline_mode = #tpu.pipeline_mode<synchronous>, transform_indices = @transform_6, window_bounds = array<i64: 1, 128>}, {pipeline_mode = #tpu.pipeline_mode<synchronous>, transform_indices = @transform_7, window_bounds = array<i64: 128, 2>}, {pipeline_mode = #tpu.pipeline_mode<synchronous>, transform_indices = @transform_8, window_bounds = array<i64: 1, 2>}, {transform_indices = @transform_9, window_bounds = array<i64: 512, 2>}]} {
    %c1_i32 = arith.constant 1 : i32
    %0 = arith.cmpi slt, %arg0, %c1_i32 : i32
    %c0 = arith.constant 0 : index
    %c0_0 = arith.constant 0 : index
    %1 = vector.load %arg1[%c0, %c0_0] : memref<512x128xf32, #tpu.memory_space<vmem>>, vector<512x128xf32>
    %c0_1 = arith.constant 0 : index
    %c0_2 = arith.constant 0 : index
    %2 = vector.load %arg2[%c0_1, %c0_2] : memref<512x128xf32, #tpu.memory_space<vmem>>, vector<512x128xf32>
    %3 = arith.subf %1, %2 : vector<512x128xf32>
    %c0_3 = arith.constant 0 : index
    %c0_4 = arith.constant 0 : index
    %4 = vector.load %arg3[%c0_3, %c0_4] : memref<512x128xf32, #tpu.memory_space<vmem>>, vector<512x128xf32>
    %5 = arith.select %0, %3, %4 : vector<512x128xf32>
    %6 = arith.truncf %5 : vector<512x128xf32> to vector<512x128xbf16>
    %c0_5 = arith.constant 0 : index
    %c0_6 = arith.constant 0 : index
    %7 = vector.load %arg4[%c0_5, %c0_6] : memref<128x128xbf16, #tpu.memory_space<vmem>>, vector<128x128xbf16>
    %cst = arith.constant dense<0.000000e+00> : vector<512x128xf32>
    %8 = tpu.matmul %6, %7, %cst {dimension_numbers = #tpu.dot_dimension_numbers<[1], [0], [0], [1], [0, 0, 1, 1], [], []>} : vector<512x128xbf16>, vector<128x128xbf16>, vector<512x128xf32> -> vector<512x128xf32>
    %c0_7 = arith.constant 0 : index
    %c0_8 = arith.constant 0 : index
    %9 = vector.load %arg5[%c0_7, %c0_8] : memref<1x128xf32, #tpu.memory_space<vmem>>, vector<1x128xf32>
    %10 = vector.broadcast %9 : vector<1x128xf32> to vector<512x128xf32>
    %11 = arith.addf %8, %10 : vector<512x128xf32>
    %cst_9 = arith.constant 0.000000e+00 : f32
    %12 = vector.broadcast %cst_9 : f32 to vector<512x128xf32>
    %13 = arith.maximumf %11, %12 : vector<512x128xf32>
    %14 = arith.truncf %13 : vector<512x128xf32> to vector<512x128xbf16>
    %c0_10 = arith.constant 0 : index
    %c0_11 = arith.constant 0 : index
    %15 = vector.load %arg6[%c0_10, %c0_11] : memref<128x128xbf16, #tpu.memory_space<vmem>>, vector<128x128xbf16>
    %cst_12 = arith.constant dense<0.000000e+00> : vector<512x128xf32>
    %16 = tpu.matmul %14, %15, %cst_12 {dimension_numbers = #tpu.dot_dimension_numbers<[1], [0], [0], [1], [0, 0, 1, 1], [], []>} : vector<512x128xbf16>, vector<128x128xbf16>, vector<512x128xf32> -> vector<512x128xf32>
    %c0_13 = arith.constant 0 : index
    %c0_14 = arith.constant 0 : index
    %17 = vector.load %arg7[%c0_13, %c0_14] : memref<1x128xf32, #tpu.memory_space<vmem>>, vector<1x128xf32>
    %18 = vector.broadcast %17 : vector<1x128xf32> to vector<512x128xf32>
    %19 = arith.addf %16, %18 : vector<512x128xf32>
    %cst_15 = arith.constant 0.000000e+00 : f32
    %20 = vector.broadcast %cst_15 : f32 to vector<512x128xf32>
    %21 = arith.maximumf %19, %20 : vector<512x128xf32>
    %22 = arith.truncf %21 : vector<512x128xf32> to vector<512x128xbf16>
    %c0_16 = arith.constant 0 : index
    %c0_17 = arith.constant 0 : index
    %23 = vector.load %arg8[%c0_16, %c0_17] : memref<128x2xbf16, #tpu.memory_space<vmem>>, vector<128x2xbf16>
    %cst_18 = arith.constant dense<0.000000e+00> : vector<512x2xf32>
    %24 = tpu.matmul %22, %23, %cst_18 {dimension_numbers = #tpu.dot_dimension_numbers<[1], [0], [0], [1], [0, 0, 1, 1], [], []>} : vector<512x128xbf16>, vector<128x2xbf16>, vector<512x2xf32> -> vector<512x2xf32>
    %c0_19 = arith.constant 0 : index
    %c0_20 = arith.constant 0 : index
    %25 = vector.load %arg9[%c0_19, %c0_20] : memref<1x2xf32, #tpu.memory_space<vmem>>, vector<1x2xf32>
    %26 = vector.broadcast %25 : vector<1x2xf32> to vector<512x2xf32>
    %27 = arith.addf %24, %26 : vector<512x2xf32>
    %c0_21 = arith.constant 0 : index
    %c0_22 = arith.constant 0 : index
    %28 = vector.load %arg10[%c0_21, %c0_22] : memref<512x2xf32, #tpu.memory_space<vmem>>, vector<512x2xf32>
    tpu.vector_store %arg10[%c0_21, %c0_22], %27 {strides = array<i32>} : memref<512x2xf32, #tpu.memory_space<vmem>>, vector<512x2xf32>,
    return
  }
  func.func @transform_0(%arg0: i32) -> (i32, i32) {
    %c0_i32 = arith.constant 0 : i32
    %0 = arith.minsi %arg0, %c0_i32 : i32
    %c0_i32_0 = arith.constant 0 : i32
    %c0_i32_1 = arith.constant 0 : i32
    return %0, %c0_i32_0 : i32, i32
  }
  func.func @transform_1(%arg0: i32) -> (i32, i32) {
    %c0_i32 = arith.constant 0 : i32
    %0 = arith.minsi %arg0, %c0_i32 : i32
    %c0_i32_0 = arith.constant 0 : i32
    %c0_i32_1 = arith.constant 0 : i32
    return %0, %c0_i32_0 : i32, i32
  }
  func.func @transform_2(%arg0: i32) -> (i32, i32) {
    %c1_i32 = arith.constant 1 : i32
    %0 = arith.subi %arg0, %c1_i32 : i32
    %c0_i32 = arith.constant 0 : i32
    %1 = arith.maxsi %0, %c0_i32 : i32
    %c0_i32_0 = arith.constant 0 : i32
    %2 = arith.minsi %1, %c0_i32_0 : i32
    %c0_i32_1 = arith.constant 0 : i32
    %c0_i32_2 = arith.constant 0 : i32
    return %2, %c0_i32_1 : i32, i32
  }
  func.func @transform_3(%arg0: i32) -> (i32, i32) {
    %c0_i32 = arith.constant 0 : i32
    %c0_i32_0 = arith.constant 0 : i32
    %c0_i32_1 = arith.constant 0 : i32
    return %c0_i32, %c0_i32_0 : i32, i32
  }
  func.func @transform_4(%arg0: i32) -> (i32, i32) {
    %c0_i32 = arith.constant 0 : i32
    %c0_i32_0 = arith.constant 0 : i32
    %c0_i32_1 = arith.constant 0 : i32
    return %c0_i32, %c0_i32_0 : i32, i32
  }
  func.func @transform_5(%arg0: i32) -> (i32, i32) {
    %c0_i32 = arith.constant 0 : i32
    %c0_i32_0 = arith.constant 0 : i32
    %c0_i32_1 = arith.constant 0 : i32
    return %c0_i32, %c0_i32_0 : i32, i32
  }
  func.func @transform_6(%arg0: i32) -> (i32, i32) {
    %c0_i32 = arith.constant 0 : i32
    %c0_i32_0 = arith.constant 0 : i32
    %c0_i32_1 = arith.constant 0 : i32
    return %c0_i32, %c0_i32_0 : i32, i32
  }
  func.func @transform_7(%arg0: i32) -> (i32, i32) {
    %c0_i32 = arith.constant 0 : i32
    %c0_i32_0 = arith.constant 0 : i32
    %c0_i32_1 = arith.constant 0 : i32
    return %c0_i32, %c0_i32_0 : i32, i32
  }
  func.func @transform_8(%arg0: i32) -> (i32, i32) {
    %c0_i32 = arith.constant 0 : i32
    %c0_i32_0 = arith.constant 0 : i32
    %c0_i32_1 = arith.constant 0 : i32
    return %c0_i32, %c0_i32_0 : i32, i32
  }
  func.func @transform_9(%arg0: i32) -> (i32, i32) {
    %c0_i32 = arith.constant 0 : i32
    %c0_i32_0 = arith.constant 0 : i32
    return %arg0, %c0_i32 : i32, i32
  }
}

</mosaic_0001>

<bundles_post_ra>
// kernel: tpu_custom_call.1
= control target key start
LH: loop header
LB: loop body
LE: loop exit
PB: predicated region body
PF: predicated region fallthrough
CT: control target
= control target key end

     0   :  { %s4126_s0 = inlined_call_operand.hbm [shape: f32[13,128], index: 0, kind: input, shape index: {}]   ;;  %s4127_s1 = inlined_call_operand.hbm [shape: f32[13,128], index: 1, kind: input, shape index: {}]   ;;  %s4128_s2 = inlined_call_operand.vmem [shape: f32[7,128], index: 2, kind: input, shape index: {}]   ;;  %s4129_s3 = inlined_call_operand.vmem [shape: bf16[128,128], index: 3, kind: input, shape index: {}]   ;;  %s4130_s4 = inlined_call_operand.vmem [shape: f32[1,128], index: 4, kind: input, shape index: {}]   ;;  %s4131_s5 = inlined_call_operand.hbm [shape: bf16[128,128], index: 5, kind: input, shape index: {}]   ;;  %s4132_s6 = inlined_call_operand.vmem [shape: f32[1,128], index: 6, kind: input, shape index: {}]   ;;  %s4133_s7 = inlined_call_operand.vmem [shape: bf16[128,2], index: 7, kind: input, shape index: {}]   ;;  %s4134_s8 = inlined_call_operand.vmem [shape: f32[1,2], index: 8, kind: input, shape index: {}]   ;;  %s4135_s9 = inlined_call_operand.vmem [shape: f32[1024,2], index: 9, kind: output, shape index: {}]  }
   0x1   :  { %4139 = sst [smem:[#allocation11_spill]] %s4126_s0 }
   0x2   :  { %4140 = sst [smem:[#allocation12_spill]] %s4131_s5 }
   0x3   :  { %14 = vsyncpa [#allocation3], 0 }
   0x4   :  { %16 = vsyncpa [#allocation3 + $0x1], 0 }
   0x5   :  { %17 = vsyncpa [#allocation5], 0 }
   0x6   :  { %19 = vsyncpa [#allocation5 + $0x1], 0  ;;  %s3024_s30 = smov 0   ;;  %s3026_s10 = smov 0  }
   0x7   :  { %s3028_s11 = smov 0   ;;  %s3030_s12 = smov 0  }
   0x8 LB: > { %s3043_s13 = sadd.s32 4294967295, %s2963_s12   ;;  %s3046_s14 = sadd.s32 1, %s2963_s12   ;;  %s2963_s12 = sphi %s3030_s12, %s4160_s12   ;;  %s2959_s11 = sphi %s3028_s11, %s4159_s11   ;;  %s2955_s10 = sphi %s3026_s10, %s4158_s10   ;;  %s2951_s30 = sphi %s3024_s30, %s4157_s30  }
   0x9   : > { %p29_p0 = scmp.lt.s32.totalorder %s2963_s12, 0  ;;  %p31_p1 = scmp.lt.s32.totalorder %s3046_s14, 0 }
   0xa   : > { %s36_s15 = sadd.s32 1, %s2959_s11  ;;  %p43_p2 = scmp.ne.s32.totalorder %s2959_s11, %s2955_s10 }
   0xb   : > { %s3054_s16 = scalar_select %p29_p0, %s2963_s12, 0 }
   0xc   : > { %s32_s17 = scalar_select %p31_p1, %s3046_s14, 0 }
   0xd   : > { %p44_p3 = scmp.eq.s32.totalorder %s2963_s12, 0  ;;  %p49_p4 = scmp.ne.s32.totalorder %s2955_s10, %s2951_s30 }
   0xe   : > { %s33_s18 = ssub.s32 %s3054_s16, %s32_s17  ;;  %p4136_p5 = scmp.eq.s32.totalorder %s3043_s13, 0 }
   0xf   : > { %p34_p6 = scmp.eq.s32.totalorder %s33_s18, 0  ;;  %p3061_p7 = por %p44_p3, %p43_p2 }
  0x10   : > { %p3067_p8 = por %p4136_p5, %p49_p4  ;;  %p2324_p9 = scmp.ge.s32.totalorder %s2963_s12, 1 }
  0x11   : > { %s4141_s19 = scalar_select %p3061_p7, 1, 0 }
  0x12   : > { %s4142_s20 = scalar_select %p3067_p8, 1, 0 }
  0x13   : > { %s3073_s21 = scalar_select %p34_p6, %s2959_s11, %s36_s15  }
  0x14   : > { %p278_p10 = scmp.lt.s32.totalorder %s2963_s12, 3  ;;  %s2965_s23 = smov [#allocation6]  }
  0x15   : > { %4143 = sst [smem:[#allocation10_spill]] %s3073_s21  ;;  %s296_s24 = sshll.u32 %s2965_s23, 4  ;;  %s297_s24 = int_to_ptr.vmem [resolvable:$true] %s296_s24 }
  0x16   : > { %p3076_p11 = pnand %p2324_p9, %p278_p10  ;;  %s4146_s5 = sld [smem:[#allocation12_spill]] }
  0x18   : > { %s4144_s22 = scalar_select %p3076_p11, 1, 0 }
  0x19   : > { %p2768_p12 = pneg %p3076_p11 }
  0x1b   : > { %p3084_p13 = pnand %p2768_p12, %p4136_p5 }
  0x1c   : > { %s2837_s28 = scalar_lea.hbm %s4146_s5, 1024 }
  0x1d   : > { %p2838_p0 = scmp.ne.s32.totalorder %s4146_s5, %s2837_s28  ;;  %p2839_p1 = pneg %p3084_p13 }
  0x1e   : > { %p2844_p4 = scmp.lt.u32.totalorder %s2837_s28, %s4146_s5 }
  0x1f   : > { %p2840_p2 = pnand %p2839_p1, %p2838_p0 }
  0x21   : > { %p2841_p3 = pneg %p2840_p2 }
  0x23   : > { %p2846_p6 = pnand %p2844_p4, %p2841_p3 }
  0x25   : > { %2849 = shalt.err (!%p2846_p6)
}
  0x26   : > { %s2850_s18 = scalar_lea.vmem %s297_s24, 1024  ;;  %p2858_p5 = scmp.lt.s32.totalorder %s297_s24, %s297_s24 }
  0x27   : > { %p2851_p9 = scmp.ne.s32.totalorder %s297_s24, %s2850_s18  ;;  %p2859_p8 = scmp.lt.s32.totalorder %s2850_s18, %s2850_s18 }
  0x29   : > { %p2853_p10 = pnand %p2851_p9, %p2839_p1  ;;  %p2860_p11 = por %p2859_p8, %p2858_p5 }
  0x2b   : > { %p2854_p12 = pneg %p2853_p10 }
  0x2d   : > { %p2861_p7 = pnand %p2860_p11, %p2854_p12 }
  0x2f   : > { %2864 = shalt.err (!%p2861_p7)
}
  0x30   : > { %s2966_s23 = smov 64   ;;  %s2967_s26 = smov 4  }
  0x31   : > { %2771 = dma.hbm_to_vmem [thread:$0]  (!%p3084_p13), %s4146_s5, 1024, %s297_s24, [#allocation5], %s2966_s23, %s2966_s23, %s2967_s26  }
  0x32   : > { %p2326_p0 = scmp.ge.s32.totalorder %s2963_s12, 2 }
  0x33   : > { %p4147_p2 = scmp.ne.s32.totalorder (!%p2326_p0), %s4141_s19, 0 }
  0x34   : > { %315 = sbr.rel (%p2326_p0) target bundleno = 130 (0x82), region = 40 }
  0x3b   : > { %318 = sbr.rel (!%p4147_p2) target bundleno = 96 (0x60), region = 44  ;;  %s319_s28 = sand.u32 (%p4147_p2), 1, %s2959_s11  }
  0x3c   : > { %s2328_s30 = sshll.u32 (%p4147_p2), %s3054_s16, 6  ;;  %s2327_s15 = sshll.u32 (%p4147_p2), %s319_s28, 9 }
  0x3d   : > { %s327_s17 = ssub.s32 (%p4147_p2), 2, %s2328_s30  ;;  %s3112_s21 = scalar_lea.sflag (%p4147_p2), [#allocation3], %s319_s28 }
  0x3e   : > { %s3109_s18 = sshll.u32 (%p4147_p2), %s327_s17, 7  ;;  %s323_s24 = scalar_lea.vmem (%p4147_p2), [#allocation2], %s2327_s15 }
  0x3f   : > { %s330_s25 = ssub.s32 (%p4147_p2), 8192, %s3109_s18 }
  0x42   : > { %331 = vsyncadd %s3112_s21, %s330_s25  ;;  %p2330_p5 = scmp.ne.s32.totalorder %s3109_s18, 0  ;;  %s2384_s23 = sshll.u32 %s3054_s16, 13 }
  0x43   : > { %s4148_s0 = sld [smem:[#allocation11_spill]]  ;;  %s336_s28 = sshll.u32 %s323_s24, 4  ;;  %s3122_s28 = int_to_ptr.vmem [resolvable:$true] %s336_s28 }
  0x49   : > { %s3120_s29 = scalar_lea.hbm %s4148_s0, %s2384_s23  ;;  %s2869_s25 = scalar_lea.hbm %s4148_s0, 256 }
  0x4a   : > { %s2865_s30 = scalar_lea.hbm %s3120_s29, %s3109_s18  ;;  %p2870_p13 = scmp.lt.u32.totalorder %s3120_s29, %s4148_s0 }
  0x4b   : > { %p2866_p7 = scmp.ne.s32.totalorder %s3120_s29, %s2865_s30  ;;  %p2871_p1 = scmp.lt.u32.totalorder %s2869_s25, %s2865_s30 }
  0x4c   : > { %p2873_p4 = scmp.lt.u32.totalorder %s2865_s30, %s3120_s29 }
  0x4d   : > { %p2867_p8 = pnand %p2866_p7, %p2330_p5  ;;  %p2872_p3 = por %p2871_p1, %p2870_p13 }
  0x4f   : > { %p2868_p11 = pneg %p2867_p8  ;;  %p2874_p6 = por %p2873_p4, %p2872_p3 }
  0x51   : > { %p2875_p9 = pnand %p2874_p6, %p2868_p11 }
  0x53   : > { %2878 = shalt.err (!%p2875_p9)
}
  0x54   : > { %s2879_s24 = scalar_lea.vmem %s3122_s28, %s3109_s18  ;;  %s2968_s23 = smov [#allocation2]  }
  0x55   : > { %p2880_p10 = scmp.ne.s32.totalorder %s3122_s28, %s2879_s24  ;;  %s2883_s27 = sshll.u32 %s2968_s23, 4  ;;  %s2884_s27 = int_to_ptr.vmem [resolvable:$false] %s2883_s27 }
  0x56   : > { %s2885_s5 = scalar_lea.vmem %s2884_s27, 16384  ;;  %p2886_p2 = scmp.lt.s32.totalorder %s3122_s28, %s2884_s27 }
  0x57   : > { %p2881_p12 = pnand %p2880_p10, %p2330_p5  ;;  %p2887_p7 = scmp.lt.s32.totalorder %s2885_s5, %s2879_s24 }
  0x59   : > { %p2882_p0 = pneg %p2881_p12  ;;  %p2888_p8 = por %p2887_p7, %p2886_p2 }
  0x5b   : > { %p2889_p13 = pnand %p2888_p8, %p2882_p0 }
  0x5d   : > { %2892 = shalt.err (!%p2889_p13)
}
  0x5e   : > { %s2969_s30 = smov 128   ;;  %s2970_s15 = smov 8  }
  0x5f   : > { %342 = dma.hbm_to_vmem [thread:$0]  (%p2330_p5), %s3120_s29, %s3109_s18, %s3122_s28, %s3112_s21, %s2969_s30, %s2969_s30, %s2970_s15  }
  0x60 PF: > { %p4149_p11 = scmp.ne.s32.totalorder %s4141_s19, 0 }
  0x61   : > { %s346_s17 = sand.u32 (%p4149_p11), 1, %s2963_s12   ;;  %s348_s25 = sand.u32 (%p4149_p11), 1, %s2959_s11  }
  0x62   : > { %345 = sbr.rel (!%p4149_p11) target bundleno = 130 (0x82), region = 48  ;;  %s2334_s26 = sshll.u32 (%p4149_p11), %s348_s25, 9 }
  0x63   : > { %s2335_s24 = sshll.u32 (%p4149_p11), %s3054_s16, 6  ;;  %s3157_s0 = scalar_lea.sflag (%p4149_p11), [#allocation5], %s346_s17 }
  0x64   : > { %s354_s23 = ssub.s32 (%p4149_p11), 2, %s2335_s24  ;;  %s350_s21 = scalar_lea.vmem (%p4149_p11), [#allocation4], %s2334_s26 }
  0x65   : > { %s3154_s27 = sshll.u32 (%p4149_p11), %s354_s23, 7 }
  0x66   : > { %s357_s5 = ssub.s32 (%p4149_p11), 8192, %s3154_s27 }
  0x69   : > { %358 = vsyncadd %s3157_s0, %s357_s5  ;;  %p2337_p5 = scmp.ne.s32.totalorder %s3154_s27, 0  ;;  %s2385_s19 = sshll.u32 %s3054_s16, 13 }
  0x6a   : > { %s3165_s29 = scalar_lea.hbm %s4127_s1, %s2385_s19  ;;  %s363_s28 = sshll.u32 %s350_s21, 4  ;;  %s3167_s28 = int_to_ptr.vmem [resolvable:$true] %s363_s28 }
  0x6b   : > { %s2893_s30 = scalar_lea.hbm %s3165_s29, %s3154_s27  ;;  %s2897_s16 = scalar_lea.hbm %s4127_s1, 256 }
  0x6c   : > { %p2894_p1 = scmp.ne.s32.totalorder %s3165_s29, %s2893_s30  ;;  %p2898_p6 = scmp.lt.u32.totalorder %s3165_s29, %s4127_s1 }
  0x6d   : > { %p2899_p9 = scmp.lt.u32.totalorder %s2897_s16, %s2893_s30  ;;  %p2901_p12 = scmp.lt.u32.totalorder %s2893_s30, %s3165_s29 }
  0x6e   : > { %p2895_p3 = pnand %p2894_p1, %p2337_p5 }
  0x6f   : > { %p2900_p10 = por %p2899_p9, %p2898_p6 }
  0x70   : > { %p2896_p4 = pneg %p2895_p3 }
  0x71   : > { %p2902_p0 = por %p2901_p12, %p2900_p10 }
  0x73   : > { %p2903_p2 = pnand %p2902_p0, %p2896_p4 }
  0x75   : > { %2906 = shalt.err (!%p2903_p2)
}
  0x76   : > { %s2907_s24 = scalar_lea.vmem %s3167_s28, %s3154_s27  ;;  %s2971_s23 = smov [#allocation4]  }
  0x77   : > { %p2908_p7 = scmp.ne.s32.totalorder %s3167_s28, %s2907_s24  ;;  %s2911_s5 = sshll.u32 %s2971_s23, 4  ;;  %s2912_s5 = int_to_ptr.vmem [resolvable:$false] %s2911_s5 }
  0x78   : > { %s2913_s21 = scalar_lea.vmem %s2912_s5, 16384  ;;  %p2914_p11 = scmp.lt.s32.totalorder %s3167_s28, %s2912_s5 }
  0x79   : > { %p2909_p8 = pnand %p2908_p7, %p2337_p5  ;;  %p2915_p1 = scmp.lt.s32.totalorder %s2913_s21, %s2907_s24 }
  0x7b   : > { %p2910_p13 = pneg %p2909_p8  ;;  %p2916_p3 = por %p2915_p1, %p2914_p11 }
  0x7d   : > { %p2917_p6 = pnand %p2916_p3, %p2910_p13 }
  0x7f   : > { %2920 = shalt.err (!%p2917_p6)
}
  0x80   : > { %s2972_s19 = smov 128   ;;  %s2973_s12 = smov 8  }
  0x81   : > { %369 = dma.hbm_to_vmem [thread:$0]  (%p2337_p5), %s3165_s29, %s3154_s27, %s3167_s28, %s3157_s0, %s2972_s19, %s2972_s19, %s2973_s12  }
  0x82 PF: > { %p4150_p4 = scmp.ne.s32.totalorder %s4144_s22, 0 }
  0x83   : > { %s400_s18 = sand.u32 (!%p4150_p4), 1, %s2955_s10   ;;  %p4151_p9 = scmp.ne.s32.totalorder (!%p4150_p4), %s4142_s20, 0 }
  0x84   : > { %398 = sbr.rel (%p4150_p4) target bundleno = 961 (0x3c1), region = 56  ;;  %s2342_s30 = sshll.u32 (!%p4150_p4), %s400_s18, 9 }
  0x85   : > { %s401_s15 = scalar_lea.sflag (!%p4150_p4), [#allocation3], %s400_s18  ;;  %s3197_s17 = scalar_lea.vmem (!%p4150_p4), [#allocation2], %s2342_s30 }
  0x8b   : > { %2938 = dma.done.wait (%p4151_p9), %s401_s15, 8192  }
  0x8c   : > { %2940 = vsyncadd (%p4151_p9), %s401_s15, 4294959104  ;;  %s409_s0 = sand.u32 1, %s3043_s13   ;;  %s3204_s29 = scalar_lea.vmem [#allocation4], %s2342_s30 }
  0x8d   : > { %s410_s27 = scalar_lea.sflag [#allocation5], %s409_s0 }
  0x8e   : > { %2942 = dma.done.wait (%p4151_p9), %s410_s27, 8192  }
  0x8f   : > { %2944 = vsyncadd (%p4151_p9), %s410_s27, 4294959104  ;;  %p4152_p5 = scmp.eq.s32.totalorder %s3043_s13, 0 }
  0x91   : > { %2946 = dma.done.wait (%p4152_p5), [#allocation5], 1024   ;;  %p4153_p10 = pmov %p4152_p5 }
  0x92   : > { %p506_p12 = scmp.lt.s32.totalorder %s3043_s13, 1  ;;  %v2813_v0 = vld [vmem:[%s4129_s3] sm:$0xff]   ;;  %v2814_v1 = vld [vmem:[%s4129_s3 + $0x8] sm:$0xff]   ;;  %v2815_v2 = vld [vmem:[%s4129_s3 + $0x10] sm:$0xff]   ;;  %vm2134_vm1 = vcmask 15360  }
  0x93   : > { %2948 = vsyncadd (%p4153_p10), [#allocation5], 4294966272  ;;  %2506 = vmatprep.subr.bf16.mxu0 %v2813_v0  ;;  %2746 = vmatprep.subr.bf16.mxu1 %v2813_v0  ;;  %v2816_v4 = vld [vmem:[%s4129_s3 + $0x18] sm:$0xff]   ;;  %v507_v5 = vld [vmem:[%s3197_s17] sm:$0xff] }
  0x94   : > { %s763_s22 = scalar_select %p506_p12, 1, 0  ;;  %2507 = vmatpush3.bf16.msra.mxu0 %v2813_v0  ;;  %2754 = vmatpush3.bf16.msra.mxu1 %v2813_v0  ;;  %v508_v6 = vld [vmem:[%s3197_s17 + $0x8] sm:$0xff]  ;;  %v571_v7 = vld [vmem:[%s3204_s29] sm:$0xff]  ;;  %v2819_v19 = vld [vmem:[%s4129_s3 + $0x30] sm:$0xff]  }
  0x95   : > { %2508 = vmatprep.subr.bf16.mxu0 %v2814_v1  ;;  %2747 = vmatprep.subr.bf16.mxu1 %v2814_v1  ;;  %v572_v9 = vld [vmem:[%s3204_s29 + $0x8] sm:$0xff]  ;;  %v635_v10 = vsub.f32 %v507_v5, %v571_v7  ;;  %v699_v11 = vld [vmem:[%s4128_s2] sm:$0xff]  ;;  %v509_v20 = vld [vmem:[%s3197_s17 + $0x10] sm:$0xff] }
  0x96   : > { %v764_v3 = vstv %s763_s22  ;;  %v700_v12 = vld [vmem:[%s4128_s2 + $0x8] sm:$0xff]  ;;  %v636_v13 = vsub.f32 %v508_v6, %v572_v9  ;;  %v2817_v15 = vld [vmem:[%s4129_s3 + $0x20] sm:$0xff]   ;;  %v510_v21 = vld [vmem:[%s3197_s17 + $0x18] sm:$0xff] }
  0x97   : > { %vm3230_vm0 = vcmp.eq.s32.totalorder %v764_v3, 1  ;;  %v2818_v18 = vld [vmem:[%s4129_s3 + $0x28] sm:$0xff]   ;;  %v573_v22 = vld [vmem:[%s3204_s29 + $0x10] sm:$0xff]  ;;  %v574_v23 = vld [vmem:[%s3204_s29 + $0x18] sm:$0xff] }
  0x98   : > { %2509 = vmatpush3.bf16.msra.mxu0 %v2814_v1  ;;  %2755 = vmatpush3.bf16.msra.mxu1 %v2814_v1  ;;  %v766_v14 = vsel %vm3230_vm0, %v635_v10, %v699_v11  ;;  %v767_v16 = vsel %vm3230_vm0, %v636_v13, %v700_v12  ;;  %v511_v24 = vld [vmem:[%s3197_s17 + $0x20] sm:$0xff]  ;;  %v512_v25 = vld [vmem:[%s3197_s17 + $0x28] sm:$0xff]  ;;  %v637_v28 = vsub.f32 %v509_v20, %v573_v22  ;;  %v2820_v30 = vld [vmem:[%s4129_s3 + $0x38] sm:$0xff]  }
  0x99   : > { %2510 = vmatprep.subr.bf16.mxu0 %v2815_v2  ;;  %2748 = vmatprep.subr.bf16.mxu1 %v2815_v2  ;;  %v830_v17 = vpack.c.bf16 %v767_v16, %v766_v14  ;;  %v575_v26 = vld [vmem:[%s3204_s29 + $0x20] sm:$0xff]  ;;  %v576_v27 = vld [vmem:[%s3204_s29 + $0x28] sm:$0xff]  ;;  %v638_v29 = vsub.f32 %v510_v21, %v574_v23  ;;  %v701_v31 = vld [vmem:[%s4128_s2 + $0x10] sm:$0xff] }
  0x9a   : > { %v702_v32 = vld [vmem:[%s4128_s2 + $0x18] sm:$0xff]  ;;  %v639_v33 = vsub.f32 %v511_v24, %v575_v26  ;;  %v640_v34 = vsub.f32 %v512_v25, %v576_v27  ;;  %v703_v35 = vld [vmem:[%s4128_s2 + $0x20] sm:$0xff]  ;;  %v704_v36 = vld [vmem:[%s4128_s2 + $0x28] sm:$0xff]  ;;  %v768_v37 = vsel %vm3230_vm0, %v637_v28, %v701_v31 }
  0x9b   : > { %2522 = vmatprep.mubr.bf16.mxu0 %v830_v17  ;;  %v769_v38 = vsel %vm3230_vm0, %v638_v29, %v702_v32  ;;  %v513_v39 = vld [vmem:[%s3197_s17 + $0x30] sm:$0xff]  ;;  %v514_v40 = vld [vmem:[%s3197_s17 + $0x38] sm:$0xff]  ;;  %v515_v45 = vld [vmem:[%s3197_s17 + $0x40] sm:$0xff] }
  0x9c   : > { %2511 = vmatpush3.bf16.msra.mxu0 %v2815_v2  ;;  %2756 = vmatpush3.bf16.msra.mxu1 %v2815_v2  ;;  %v770_v41 = vsel %vm3230_vm0, %v639_v33, %v703_v35  ;;  %v771_v42 = vsel %vm3230_vm0, %v640_v34, %v704_v36  ;;  %v577_v43 = vld [vmem:[%s3204_s29 + $0x30] sm:$0xff]  ;;  %v578_v44 = vld [vmem:[%s3204_s29 + $0x38] sm:$0xff]  ;;  %v516_v46 = vld [vmem:[%s3197_s17 + $0x48] sm:$0xff]  ;;  %v831_v49 = vpack.c.bf16 %v769_v38, %v768_v37 }
  0x9d   : > { %2512 = vmatprep.subr.bf16.mxu0 %v2816_v4  ;;  %2749 = vmatprep.subr.bf16.mxu1 %v2816_v4  ;;  %v579_v47 = vld [vmem:[%s3204_s29 + $0x40] sm:$0xff]  ;;  %v580_v48 = vld [vmem:[%s3204_s29 + $0x48] sm:$0xff]  ;;  %v832_v50 = vpack.c.bf16 %v771_v42, %v770_v41  ;;  %v641_v51 = vsub.f32 %v513_v39, %v577_v43  ;;  %v642_v52 = vsub.f32 %v514_v40, %v578_v44  ;;  %v705_v53 = vld [vmem:[%s4128_s2 + $0x30] sm:$0xff] }
  0x9e   : > { %v706_v54 = vld [vmem:[%s4128_s2 + $0x38] sm:$0xff]  ;;  %v643_v55 = vsub.f32 %v515_v45, %v579_v47  ;;  %v644_v56 = vsub.f32 %v516_v46, %v580_v48  ;;  %v707_v57 = vld [vmem:[%s4128_s2 + $0x40] sm:$0xff]  ;;  %v708_v58 = vld [vmem:[%s4128_s2 + $0x48] sm:$0xff] }
  0x9f   : > { %v772_v59 = vsel %vm3230_vm0, %v641_v51, %v705_v53  ;;  %v773_v60 = vsel %vm3230_vm0, %v642_v52, %v706_v54  ;;  %v517_v61 = vld [vmem:[%s3197_s17 + $0x50] sm:$0xff]  ;;  %v518_v62 = vld [vmem:[%s3197_s17 + $0x58] sm:$0xff]  ;;  %v519_v3 = vld [vmem:[%s3197_s17 + $0x60] sm:$0xff] }
  0xa0   : > { %2513 = vmatpush3.bf16.msra.mxu0 %v2816_v4  ;;  %2757 = vmatpush3.bf16.msra.mxu1 %v2816_v4  ;;  %v774_v63 = vsel %vm3230_vm0, %v643_v55, %v707_v57  ;;  %v775_v0 = vsel %vm3230_vm0, %v644_v56, %v708_v58  ;;  %v581_v1 = vld [vmem:[%s3204_s29 + $0x50] sm:$0xff]  ;;  %v582_v2 = vld [vmem:[%s3204_s29 + $0x58] sm:$0xff]  ;;  %v520_v4 = vld [vmem:[%s3197_s17 + $0x68] sm:$0xff]  ;;  %v833_v7 = vpack.c.bf16 %v773_v60, %v772_v59 }
  0xa1   : > { %2514 = vmatprep.subr.bf16.mxu0 %v2817_v15  ;;  %2750 = vmatprep.subr.bf16.mxu1 %v2817_v15  ;;  %v583_v5 = vld [vmem:[%s3204_s29 + $0x60] sm:$0xff]  ;;  %v584_v6 = vld [vmem:[%s3204_s29 + $0x68] sm:$0xff]  ;;  %v709_v9 = vld [vmem:[%s4128_s2 + $0x50] sm:$0xff]  ;;  %v834_v10 = vpack.c.bf16 %v775_v0, %v774_v63  ;;  %v645_v11 = vsub.f32 %v517_v61, %v581_v1  ;;  %v646_v12 = vsub.f32 %v518_v62, %v582_v2 }
  0xa2   : > { %v710_v13 = vld [vmem:[%s4128_s2 + $0x58] sm:$0xff]  ;;  %v711_v14 = vld [vmem:[%s4128_s2 + $0x60] sm:$0xff]  ;;  %v647_v16 = vsub.f32 %v519_v3, %v583_v5  ;;  %v648_v17 = vsub.f32 %v520_v4, %v584_v6  ;;  %v540_v21 = vld [vmem:[%s3197_s17 + $0x108] sm:$0xff] }
  0xa3   : > { %v539_v20 = vld [vmem:[%s3197_s17 + $0x100] sm:$0xff]  ;;  %v3343_v23 = vld [vmem:[%s3197_s17 + $0x78] sm:$0xff]  ;;  %v604_v25 = vld [vmem:[%s3204_s29 + $0x108] sm:$0xff]  ;;  %v776_v33 = vsel %vm3230_vm0, %v645_v11, %v709_v9  ;;  %v777_v34 = vsel %vm3230_vm0, %v646_v12, %v710_v13 }
  0xa4   : > { %2515 = vmatpush3.bf16.msra.mxu0 %v2817_v15  ;;  %2758 = vmatpush3.bf16.msra.mxu1 %v2817_v15  ;;  %v712_v15 = vld [vmem:[%s4128_s2 + $0x68] sm:$0xff]  ;;  %v603_v22 = vld [vmem:[%s3204_s29 + $0x100] sm:$0xff]  ;;  %v3346_v24 = vld [vmem:[%s3204_s29 + $0x78] sm:$0xff]  ;;  %v668_v29 = vsub.f32 %v540_v21, %v604_v25  ;;  %v778_v44 = vsel %vm3230_vm0, %v647_v16, %v711_v14  ;;  %v835_v60 = vpack.c.bf16 %v777_v34, %v776_v33 }
  0xa5   : > { %2516 = vmatprep.subr.bf16.mxu0 %v2818_v18  ;;  %2751 = vmatprep.subr.bf16.mxu1 %v2818_v18  ;;  %v667_v26 = vsub.f32 %v539_v20, %v603_v22  ;;  %v731_v27 = vld [vmem:[%s4128_s2 + $0x100] sm:$0xff]  ;;  %v732_v28 = vld [vmem:[%s4128_s2 + $0x108] sm:$0xff]  ;;  %v542_v31 = vld [vmem:[%s3197_s17 + $0x118] sm:$0xff]  ;;  %v779_v45 = vsel %vm3230_vm0, %v648_v17, %v712_v15  ;;  %v650_v61 = vsub.f32 %v3343_v23, %v3346_v24 }
  0xa6   : > { %v605_v32 = vld [vmem:[%s3204_s29 + $0x110] sm:$0xff]  ;;  %v3363_v35 = vld [vmem:[%s3197_s17 + $0x80] sm:$0xff]  ;;  %v3366_v36 = vld [vmem:[%s3197_s17 + $0x88] sm:$0xff]  ;;  %v799_v47 = vsel %vm3230_vm0, %v668_v29, %v732_v28  ;;  %v836_v3 = vpack.c.bf16 %v779_v45, %v778_v44 }
  0xa7   : > { %v3369_v37 = vld [vmem:[%s3204_s29 + $0x80] sm:$0xff]  ;;  %v3372_v38 = vld [vmem:[%s3204_s29 + $0x88] sm:$0xff]  ;;  %v798_v39 = vsel %vm3230_vm0, %v667_v26, %v731_v27  ;;  %v606_v40 = vld [vmem:[%s3204_s29 + $0x118] sm:$0xff] }
  0xa8   : > { %2517 = vmatpush3.bf16.msra.mxu0 %v2818_v18  ;;  %2759 = vmatpush3.bf16.msra.mxu1 %v2818_v18  ;;  %v3334_v18 = vld [vmem:[%s3197_s17 + $0x70] sm:$0xff]  ;;  %v734_v43 = vld [vmem:[%s4128_s2 + $0x118] sm:$0xff]  ;;  %v670_v48 = vsub.f32 %v542_v31, %v606_v40  ;;  %v607_v51 = vld [vmem:[%s3204_s29 + $0x120] sm:$0xff]  ;;  %v846_v54 = vpack.c.bf16 %v799_v47, %v798_v39  ;;  %v651_v13 = vsub.f32 %v3363_v35, %v3369_v37 }
  0xa9   : > { %2518 = vmatprep.subr.bf16.mxu0 %v2819_v19  ;;  %2752 = vmatprep.subr.bf16.mxu1 %v2819_v19  ;;  %v733_v42 = vld [vmem:[%s4128_s2 + $0x110] sm:$0xff]  ;;  %v714_v53 = vld [vmem:[%s4128_s2 + $0x78] sm:$0xff]  ;;  %v608_v56 = vld [vmem:[%s3204_s29 + $0x128] sm:$0xff]  ;;  %v652_v14 = vsub.f32 %v3366_v36, %v3372_v38 }
  0xaa   : > { %v713_v46 = vld [vmem:[%s4128_s2 + $0x70] sm:$0xff]  ;;  %v735_v58 = vld [vmem:[%s4128_s2 + $0x120] sm:$0xff]  ;;  %v736_v59 = vld [vmem:[%s4128_s2 + $0x128] sm:$0xff]  ;;  %v801_v62 = vsel %vm3230_vm0, %v670_v48, %v734_v43  ;;  %2554 = vmatprep.mubr.bf16.mxu1 %v846_v54  ;;  %v781_v28 = vsel %vm3230_vm0, %v650_v61, %v714_v53 }
  0xab   : > { %v545_v0 = vld [vmem:[%s3197_s17 + $0x130] sm:$0xff]  ;;  %v546_v1 = vld [vmem:[%s3197_s17 + $0x138] sm:$0xff]  ;;  %v715_v4 = vld [vmem:[%s4128_s2 + $0x80] sm:$0xff] }
  0xac   : > { %2519 = vmatpush3.bf16.msra.mxu0 %v2819_v19  ;;  %2760 = vmatpush3.bf16.msra.mxu1 %v2819_v19  ;;  %v3337_v19 = vld [vmem:[%s3204_s29 + $0x70] sm:$0xff]  ;;  %v716_v5 = vld [vmem:[%s4128_s2 + $0x88] sm:$0xff]  ;;  %v610_v9 = vld [vmem:[%s3204_s29 + $0x138] sm:$0xff] }
  0xad   : > { %2520 = vmatprep.subr.bf16.mxu0 %v2820_v30  ;;  %2753 = vmatprep.subr.bf16.mxu1 %v2820_v30  ;;  %v649_v52 = vsub.f32 %v3334_v18, %v3337_v19  ;;  %v609_v2 = vld [vmem:[%s3204_s29 + $0x130] sm:$0xff]  ;;  %v738_v12 = vld [vmem:[%s4128_s2 + $0x138] sm:$0xff]  ;;  %v674_v17 = vsub.f32 %v546_v1, %v610_v9  ;;  %v547_v18 = vld [vmem:[%s3197_s17 + $0x140] sm:$0xff] }
  0xae   : > { %v737_v11 = vld [vmem:[%s4128_s2 + $0x130] sm:$0xff]  ;;  %v548_v19 = vld [vmem:[%s3197_s17 + $0x148] sm:$0xff]  ;;  %v611_v20 = vld [vmem:[%s3204_s29 + $0x140] sm:$0xff] }
  0xaf   : > { %v525_v15 = vld [vmem:[%s3197_s17 + $0x90] sm:$0xff]  ;;  %v780_v21 = vsel %vm3230_vm0, %v649_v52, %v713_v46  ;;  %v526_v22 = vld [vmem:[%s3197_s17 + $0x98] sm:$0xff]  ;;  %v612_v24 = vld [vmem:[%s3204_s29 + $0x148] sm:$0xff]  ;;  %v675_v25 = vsub.f32 %v547_v18, %v611_v20 }
  0xb0   : > { %2521 = vmatpush3.bf16.msra.mxu0 %v2820_v30  ;;  %2761 = vmatpush3.bf16.msra.mxu1 %v2820_v30  ;;  %v541_v30 = vld [vmem:[%s3197_s17 + $0x110] sm:$0xff]  ;;  %v739_v26 = vld [vmem:[%s4128_s2 + $0x140] sm:$0xff]  ;;  %v740_v27 = vld [vmem:[%s4128_s2 + $0x148] sm:$0xff]  ;;  %v676_v33 = vsub.f32 %v548_v19, %v612_v24  ;;  %v837_v47 = vpack.c.bf16 %v781_v28, %v780_v21 }
  0xb1   : > { %v669_v41 = vsub.f32 %v541_v30, %v605_v32  ;;  %v589_v29 = vld [vmem:[%s3204_s29 + $0x90] sm:$0xff]  ;;  %v590_v30 = vld [vmem:[%s3204_s29 + $0x98] sm:$0xff]  ;;  %v805_v32 = vsel %vm3230_vm0, %v674_v17, %v738_v12  ;;  %v527_v35 = vld [vmem:[%s3197_s17 + $0xa0] sm:$0xff]  ;;  %v806_v37 = vsel %vm3230_vm0, %v675_v25, %v739_v26 }
  0xb2   : > { %v549_v34 = vld [vmem:[%s3197_s17 + $0x150] sm:$0xff]  ;;  %v528_v36 = vld [vmem:[%s3197_s17 + $0xa8] sm:$0xff]  ;;  %v550_v38 = vld [vmem:[%s3197_s17 + $0x158] sm:$0xff]  ;;  %v807_v43 = vsel %vm3230_vm0, %v676_v33, %v740_v27  ;;  %v653_v48 = vsub.f32 %v525_v15, %v589_v29  ;;  %v654_v53 = vsub.f32 %v526_v22, %v590_v30 }
  0xb3   : > { %2523 = vmatmul.mubr.bf16.vlgmr.msra.gmra.mrb[0].mxu0 %v831_v49  ;;  %v543_v49 = vld [vmem:[%s3197_s17 + $0x120] sm:$0xff]  ;;  %v800_v55 = vsel %vm3230_vm0, %v669_v41, %v733_v42  ;;  %v613_v39 = vld [vmem:[%s3204_s29 + $0x150] sm:$0xff]  ;;  %v614_v40 = vld [vmem:[%s3204_s29 + $0x158] sm:$0xff]  ;;  %v782_v41 = vsel %vm3230_vm0, %v651_v13, %v715_v4  ;;  %v783_v42 = vsel %vm3230_vm0, %v652_v14, %v716_v5 }
  0xb4   : > { %2526 = vmatprep.mubr.bf16.mxu0 %v832_v50  ;;  %v544_v50 = vld [vmem:[%s3197_s17 + $0x128] sm:$0xff]  ;;  %v671_v57 = vsub.f32 %v543_v49, %v607_v51  ;;  %v847_v6 = vpack.c.bf16 %v801_v62, %v800_v55  ;;  %v551_v44 = vld [vmem:[%s3197_s17 + $0x160] sm:$0xff]  ;;  %v717_v54 = vld [vmem:[%s4128_s2 + $0x90] sm:$0xff] }
  0xb5   : > { %v672_v63 = vsub.f32 %v544_v50, %v608_v56  ;;  %v552_v45 = vld [vmem:[%s3197_s17 + $0x168] sm:$0xff]  ;;  %v615_v46 = vld [vmem:[%s3204_s29 + $0x160] sm:$0xff]  ;;  %v718_v55 = vld [vmem:[%s4128_s2 + $0x98] sm:$0xff]  ;;  %v850_v56 = vpack.c.bf16 %v807_v43, %v806_v37 }
  0xb6   : > { %2555 = vmatmul.mubr.bf16.vlgmr.msra.gmra.mrb[0].mxu1 %v847_v6  ;;  %v591_v49 = vld [vmem:[%s3204_s29 + $0xa0] sm:$0xff]  ;;  %v592_v50 = vld [vmem:[%s3204_s29 + $0xa8] sm:$0xff]  ;;  %v741_v61 = vld [vmem:[%s4128_s2 + $0x150] sm:$0xff]  ;;  %v784_v6 = vsel %vm3230_vm0, %v653_v48, %v717_v54 }
  0xb7   : > { %v803_v16 = vsel %vm3230_vm0, %v672_v63, %v736_v59  ;;  %v616_v52 = vld [vmem:[%s3204_s29 + $0x168] sm:$0xff]  ;;  %v838_v59 = vpack.c.bf16 %v783_v42, %v782_v41  ;;  %v742_v62 = vld [vmem:[%s4128_s2 + $0x158] sm:$0xff]  ;;  %v679_v63 = vsub.f32 %v551_v44, %v615_v46  ;;  %v655_v1 = vsub.f32 %v527_v35, %v591_v49  ;;  %v743_v4 = vld [vmem:[%s4128_s2 + $0x160] sm:$0xff] }
  0xb8   : > { %v744_v5 = vld [vmem:[%s4128_s2 + $0x168] sm:$0xff]  ;;  %v530_v9 = vld [vmem:[%s3197_s17 + $0xb8] sm:$0xff]  ;;  %v553_v15 = vld [vmem:[%s3197_s17 + $0x170] sm:$0xff] }
  0xb9   : > { %v594_v12 = vld [vmem:[%s3204_s29 + $0xb8] sm:$0xff]  ;;  %v531_v17 = vld [vmem:[%s3197_s17 + $0xc0] sm:$0xff]  ;;  %v810_v18 = vsel %vm3230_vm0, %v679_v63, %v743_v4  ;;  %v617_v20 = vld [vmem:[%s3204_s29 + $0x170] sm:$0xff] }
  0xba   : > { %v618_v21 = vld [vmem:[%s3204_s29 + $0x178] sm:$0xff]  ;;  %v555_v22 = vld [vmem:[%s3197_s17 + $0x180] sm:$0xff]  ;;  %v556_v25 = vld [vmem:[%s3197_s17 + $0x188] sm:$0xff] }
  0xbb   : > { %2527 = vmatmul.mubr.bf16.gmra.mrb[4].mxu0 %v833_v7  ;;  %v802_v7 = vsel %vm3230_vm0, %v671_v57, %v735_v58  ;;  %v677_v57 = vsub.f32 %v549_v34, %v613_v39  ;;  %v678_v58 = vsub.f32 %v550_v38, %v614_v40  ;;  %v619_v26 = vld [vmem:[%s3204_s29 + $0x180] sm:$0xff]  ;;  %v620_v27 = vld [vmem:[%s3204_s29 + $0x188] sm:$0xff]  ;;  %v658_v34 = vsub.f32 %v530_v9, %v594_v12  ;;  %v721_v35 = vld [vmem:[%s4128_s2 + $0xb0] sm:$0xff] }
  0xbc   : > { %2530 = vmatprep.mubr.bf16.mxu0 %v834_v10  ;;  %v673_v10 = vsub.f32 %v545_v0, %v609_v2  ;;  %v848_v23 = vpack.c.bf16 %v803_v16, %v802_v7  ;;  %v680_v0 = vsub.f32 %v552_v45, %v616_v52  ;;  %v656_v2 = vsub.f32 %v528_v36, %v592_v50  ;;  %v529_v7 = vld [vmem:[%s3197_s17 + $0xb0] sm:$0xff]  ;;  %v554_v16 = vld [vmem:[%s3197_s17 + $0x178] sm:$0xff]  ;;  %v532_v30 = vld [vmem:[%s3197_s17 + $0xc8] sm:$0xff] }
  0xbd   : > { %v808_v13 = vsel %vm3230_vm0, %v677_v57, %v741_v61  ;;  %v809_v14 = vsel %vm3230_vm0, %v678_v58, %v742_v62  ;;  %v722_v36 = vld [vmem:[%s4128_s2 + $0xb8] sm:$0xff]  ;;  %v681_v38 = vsub.f32 %v553_v15, %v617_v20  ;;  %v682_v39 = vsub.f32 %v554_v16, %v618_v21  ;;  %v723_v41 = vld [vmem:[%s4128_s2 + $0xc0] sm:$0xff]  ;;  %v745_v42 = vld [vmem:[%s4128_s2 + $0x170] sm:$0xff] }
  0xbe   : > { %v804_v31 = vsel %vm3230_vm0, %v673_v10, %v737_v11  ;;  %2558 = vmatprep.mubr.bf16.mxu1 %v848_v23  ;;  %v593_v10 = vld [vmem:[%s3204_s29 + $0xb0] sm:$0xff]  ;;  %v785_v11 = vsel %vm3230_vm0, %v654_v53, %v718_v55  ;;  %v811_v19 = vsel %vm3230_vm0, %v680_v0, %v744_v5  ;;  %v851_v33 = vpack.c.bf16 %v809_v14, %v808_v13  ;;  %v746_v43 = vld [vmem:[%s4128_s2 + $0x178] sm:$0xff]  ;;  %v724_v48 = vld [vmem:[%s4128_s2 + $0xc8] sm:$0xff] }
  0xbf   : > { %v849_v51 = vpack.c.bf16 %v805_v32, %v804_v31  ;;  %v839_v28 = vpack.c.bf16 %v785_v11, %v784_v6  ;;  %v657_v29 = vsub.f32 %v529_v7, %v593_v10  ;;  %v595_v31 = vld [vmem:[%s3204_s29 + $0xc0] sm:$0xff]  ;;  %v596_v32 = vld [vmem:[%s3204_s29 + $0xc8] sm:$0xff]  ;;  %v852_v37 = vpack.c.bf16 %v811_v19, %v810_v18  ;;  %v533_v52 = vld [vmem:[%s3197_s17 + $0xd0] sm:$0xff] }
  0xc0   : > { %v683_v44 = vsub.f32 %v555_v22, %v619_v26  ;;  %v684_v45 = vsub.f32 %v556_v25, %v620_v27  ;;  %v659_v46 = vsub.f32 %v531_v17, %v595_v31  ;;  %v747_v49 = vld [vmem:[%s4128_s2 + $0x180] sm:$0xff]  ;;  %v748_v50 = vld [vmem:[%s4128_s2 + $0x188] sm:$0xff]  ;;  %v534_v53 = vld [vmem:[%s3197_s17 + $0xd8] sm:$0xff]  ;;  %v789_v55 = vsel %vm3230_vm0, %v658_v34, %v722_v36 }
  0xc1   : > { %2559 = vmatmul.mubr.bf16.gmra.mrb[4].mxu1 %v849_v51  ;;  %v788_v51 = vsel %vm3230_vm0, %v657_v29, %v721_v35  ;;  %v597_v54 = vld [vmem:[%s3204_s29 + $0xd0] sm:$0xff]  ;;  %v812_v57 = vsel %vm3230_vm0, %v681_v38, %v745_v42  ;;  %v813_v58 = vsel %vm3230_vm0, %v682_v39, %v746_v43  ;;  %v535_v61 = vld [vmem:[%s3197_s17 + $0xe0] sm:$0xff]  ;;  %v560_v5 = vld [vmem:[%s3197_s17 + $0x1a8] sm:$0xff] }
  0xc2   : > { %2562 = vmatprep.mubr.bf16.mxu1 %v850_v56  ;;  %v598_v56 = vld [vmem:[%s3204_s29 + $0xd8] sm:$0xff]  ;;  %v814_v62 = vsel %vm3230_vm0, %v683_v44, %v747_v49  ;;  %v815_v63 = vsel %vm3230_vm0, %v684_v45, %v748_v50  ;;  %v621_v0 = vld [vmem:[%s3204_s29 + $0x190] sm:$0xff]  ;;  %v623_v6 = vld [vmem:[%s3204_s29 + $0x1a0] sm:$0xff]  ;;  %v841_v9 = vpack.c.bf16 %v789_v55, %v788_v51  ;;  %v661_v10 = vsub.f32 %v533_v52, %v597_v54 }
  0xc3   : > { %2531 = vmatmul.mubr.bf16.gmra.mrb[8].mxu0 %v835_v60  ;;  %v719_v60 = vld [vmem:[%s4128_s2 + $0xa0] sm:$0xff]  ;;  %v624_v7 = vld [vmem:[%s3204_s29 + $0x1a8] sm:$0xff]  ;;  %v853_v14 = vpack.c.bf16 %v813_v58, %v812_v57  ;;  %v662_v15 = vsub.f32 %v534_v53, %v598_v56  ;;  %v725_v16 = vld [vmem:[%s4128_s2 + $0xd0] sm:$0xff]  ;;  %v854_v18 = vpack.c.bf16 %v815_v63, %v814_v62 }
  0xc4   : > { %2534 = vmatprep.mubr.bf16.mxu0 %v836_v3  ;;  %v720_v3 = vld [vmem:[%s4128_s2 + $0xa8] sm:$0xff]  ;;  %v786_v23 = vsel %vm3230_vm0, %v655_v1, %v719_v60  ;;  %v558_v60 = vld [vmem:[%s3197_s17 + $0x198] sm:$0xff]  ;;  %v599_v12 = vld [vmem:[%s3204_s29 + $0xe0] sm:$0xff]  ;;  %v688_v27 = vsub.f32 %v560_v5, %v624_v7 }
  0xc5   : > { %v787_v24 = vsel %vm3230_vm0, %v656_v2, %v720_v3  ;;  %v622_v1 = vld [vmem:[%s3204_s29 + $0x198] sm:$0xff]  ;;  %v559_v2 = vld [vmem:[%s3197_s17 + $0x1a0] sm:$0xff]  ;;  %v790_v3 = vsel %vm3230_vm0, %v659_v46, %v723_v41  ;;  %v536_v11 = vld [vmem:[%s3197_s17 + $0xe8] sm:$0xff] }
  0xc6   : > { %v840_v40 = vpack.c.bf16 %v787_v24, %v786_v23  ;;  %v600_v13 = vld [vmem:[%s3204_s29 + $0xe8] sm:$0xff]  ;;  %v726_v17 = vld [vmem:[%s4128_s2 + $0xd8] sm:$0xff]  ;;  %v686_v20 = vsub.f32 %v558_v60, %v622_v1  ;;  %v749_v21 = vld [vmem:[%s4128_s2 + $0x190] sm:$0xff]  ;;  %v687_v26 = vsub.f32 %v559_v2, %v623_v6 }
  0xc7   : > { %v727_v23 = vld [vmem:[%s4128_s2 + $0xe0] sm:$0xff]  ;;  %v728_v24 = vld [vmem:[%s4128_s2 + $0xe8] sm:$0xff]  ;;  %v750_v25 = vld [vmem:[%s4128_s2 + $0x198] sm:$0xff]  ;;  %v664_v31 = vsub.f32 %v536_v11, %v600_v13  ;;  %v793_v41 = vsel %vm3230_vm0, %v662_v15, %v726_v17 }
  0xc8   : > { %v752_v29 = vld [vmem:[%s4128_s2 + $0x1a8] sm:$0xff]  ;;  %v3618_v34 = vld [vmem:[%s3197_s17 + $0xf0] sm:$0xff]  ;;  %v626_v39 = vld [vmem:[%s3204_s29 + $0x1b8] sm:$0xff]  ;;  %v817_v45 = vsel %vm3230_vm0, %v686_v20, %v750_v25 }
  0xc9   : > { %2563 = vmatmul.mubr.bf16.gmra.mrb[8].mxu1 %v851_v33  ;;  %v792_v33 = vsel %vm3230_vm0, %v661_v10, %v725_v16  ;;  %v601_v35 = vld [vmem:[%s3204_s29 + $0xf0] sm:$0xff]  ;;  %v538_v42 = vld [vmem:[%s3197_s17 + $0xf8] sm:$0xff]  ;;  %v563_v46 = vld [vmem:[%s3197_s17 + $0x1c0] sm:$0xff]  ;;  %v819_v49 = vsel %vm3230_vm0, %v688_v27, %v752_v29  ;;  %v795_v52 = vsel %vm3230_vm0, %v664_v31, %v728_v24 }
  0xca   : > { %2566 = vmatprep.mubr.bf16.mxu1 %v852_v37  ;;  %v561_v36 = vld [vmem:[%s3197_s17 + $0x1b0] sm:$0xff]  ;;  %v562_v37 = vld [vmem:[%s3197_s17 + $0x1b8] sm:$0xff]  ;;  %v627_v50 = vld [vmem:[%s3204_s29 + $0x1c0] sm:$0xff]  ;;  %v843_v54 = vpack.c.bf16 %v793_v41, %v792_v33 }
  0xcb   : > { %2535 = vmatmul.mubr.bf16.gmra.mrb[12].mxu0 %v837_v47  ;;  %v660_v47 = vsub.f32 %v532_v30, %v596_v32  ;;  %v663_v30 = vsub.f32 %v535_v61, %v599_v12  ;;  %v2821_v32 = vld [vmem:[#allocation6] sm:$0xff]   ;;  %v625_v38 = vld [vmem:[%s3204_s29 + $0x1b0] sm:$0xff]  ;;  %v602_v43 = vld [vmem:[%s3204_s29 + $0xf8] sm:$0xff]  ;;  %v691_v5 = vsub.f32 %v563_v46, %v627_v50 }
  0xcc   : > { %2538 = vmatprep.mubr.bf16.mxu0 %v838_v59  ;;  %v557_v59 = vld [vmem:[%s3197_s17 + $0x190] sm:$0xff]  ;;  %2586 = vmatprep.subr.bf16.mxu1 %v2821_v32  ;;  %v628_v53 = vld [vmem:[%s3204_s29 + $0x1c8] sm:$0xff]  ;;  %v754_v57 = vld [vmem:[%s4128_s2 + $0x1b8] sm:$0xff]  ;;  %v689_v63 = vsub.f32 %v561_v36, %v625_v38 }
  0xcd   : > { %v791_v4 = vsel %vm3230_vm0, %v660_v47, %v724_v48  ;;  %v685_v19 = vsub.f32 %v557_v59, %v621_v0  ;;  %v564_v47 = vld [vmem:[%s3197_s17 + $0x1c8] sm:$0xff]  ;;  %v794_v51 = vsel %vm3230_vm0, %v663_v30, %v727_v23  ;;  %2587 = vmatpush3.bf16.msra.mxu1 %v2821_v32  ;;  %v753_v56 = vld [vmem:[%s4128_s2 + $0x1b0] sm:$0xff]  ;;  %v665_v59 = vsub.f32 %v3618_v34, %v601_v35  ;;  %v730_v61 = vld [vmem:[%s4128_s2 + $0xf8] sm:$0xff] }
  0xce   : > { %v842_v22 = vpack.c.bf16 %v791_v4, %v790_v3  ;;  %v2823_v58 = vld [vmem:[#allocation6 + $0x10] sm:$0xff]   ;;  %v690_v0 = vsub.f32 %v562_v37, %v626_v39  ;;  %v755_v1 = vld [vmem:[%s4128_s2 + $0x1c0] sm:$0xff]  ;;  %v756_v2 = vld [vmem:[%s4128_s2 + $0x1c8] sm:$0xff]  ;;  %v844_v3 = vpack.c.bf16 %v795_v52, %v794_v51  ;;  %v666_v4 = vsub.f32 %v538_v42, %v602_v43 }
  0xcf   : > { %v816_v44 = vsel %vm3230_vm0, %v685_v19, %v749_v21  ;;  %v729_v60 = vld [vmem:[%s4128_s2 + $0xf0] sm:$0xff]  ;;  %v692_v6 = vsub.f32 %v564_v47, %v628_v53  ;;  %v2824_v7 = vld [vmem:[#allocation6 + $0x18] sm:$0xff]   ;;  %v820_v13 = vsel %vm3230_vm0, %v689_v63, %v753_v56  ;;  %v567_v15 = vld [vmem:[%s3197_s17 + $0x1e0] sm:$0xff]  ;;  %v822_v21 = vsel %vm3230_vm0, %v691_v5, %v755_v1 }
  0xd0   : > { %v855_v55 = vpack.c.bf16 %v817_v45, %v816_v44  ;;  %v566_v10 = vld [vmem:[%s3197_s17 + $0x1d8] sm:$0xff]  ;;  %v629_v11 = vld [vmem:[%s3204_s29 + $0x1d0] sm:$0xff]  ;;  %v568_v16 = vld [vmem:[%s3197_s17 + $0x1e8] sm:$0xff]  ;;  %v796_v19 = vsel %vm3230_vm0, %v665_v59, %v729_v60  ;;  %v797_v20 = vsel %vm3230_vm0, %v666_v4, %v730_v61 }
  0xd1   : > { %2567 = vmatmul.mubr.bf16.gmra.mrb[12].mxu1 %v853_v14  ;;  %v630_v12 = vld [vmem:[%s3204_s29 + $0x1d8] sm:$0xff]  ;;  %v821_v14 = vsel %vm3230_vm0, %v690_v0, %v754_v57  ;;  %v631_v17 = vld [vmem:[%s3204_s29 + $0x1e0] sm:$0xff]  ;;  %v845_v25 = vpack.c.bf16 %v797_v20, %v796_v19  ;;  %v757_v29 = vld [vmem:[%s4128_s2 + $0x1d0] sm:$0xff] }
  0xd2   : > { %2570 = vmatprep.mubr.bf16.mxu1 %v854_v18  ;;  %v632_v18 = vld [vmem:[%s3204_s29 + $0x1e8] sm:$0xff]  ;;  %v857_v23 = vpack.c.bf16 %v821_v14, %v820_v13  ;;  %v2825_v24 = vld [vmem:[#allocation6 + $0x20] sm:$0xff]   ;;  %v758_v30 = vld [vmem:[%s4128_s2 + $0x1d8] sm:$0xff]  ;;  %v695_v31 = vsub.f32 %v567_v15, %v631_v17 }
  0xd3   : > { %2539 = vmatmul.mubr.bf16.gmra.mrb[16].mxu0 %v839_v28  ;;  %v751_v28 = vld [vmem:[%s4128_s2 + $0x1a0] sm:$0xff]  ;;  %v696_v32 = vsub.f32 %v568_v16, %v632_v18  ;;  %v760_v34 = vld [vmem:[%s4128_s2 + $0x1e8] sm:$0xff]  ;;  %v569_v38 = vld [vmem:[%s3197_s17 + $0x1f0] sm:$0xff] }
  0xd4   : > { %2542 = vmatprep.mubr.bf16.mxu0 %v840_v40  ;;  %v2822_v40 = vld [vmem:[#allocation6 + $0x8] sm:$0xff]   ;;  %v818_v48 = vsel %vm3230_vm0, %v687_v26, %v751_v28  ;;  %v694_v28 = vsub.f32 %v566_v10, %v630_v12  ;;  %v759_v33 = vld [vmem:[%s4128_s2 + $0x1e0] sm:$0xff]  ;;  %v570_v41 = vld [vmem:[%s3197_s17 + $0x1f8] sm:$0xff] }
  0xd5   : > { %2588 = vmatprep.subr.bf16.mxu1 %v2822_v40  ;;  %v856_v62 = vpack.c.bf16 %v819_v49, %v818_v48  ;;  %v2826_v35 = vld [vmem:[#allocation6 + $0x28] sm:$0xff]   ;;  %v826_v39 = vsel %vm3230_vm0, %v695_v31, %v759_v33  ;;  %v633_v42 = vld [vmem:[%s3204_s29 + $0x1f0] sm:$0xff]  ;;  %v634_v43 = vld [vmem:[%s3204_s29 + $0x1f8] sm:$0xff]  ;;  %s2353_s29 = sshll.u32 %s3043_s13, 6 }
  0xd6   : > { %2589 = vmatpush3.bf16.msra.mxu1 %v2822_v40  ;;  %v825_v37 = vsel %vm3230_vm0, %v694_v28, %v758_v30  ;;  %v827_v40 = vsel %vm3230_vm0, %v696_v32, %v760_v34  ;;  %v2827_v45 = vld [vmem:[#allocation6 + $0x30] sm:$0xff]   ;;  %v697_v47 = vsub.f32 %v569_v38, %v633_v42  ;;  %v698_v48 = vsub.f32 %v570_v41, %v634_v43  ;;  %v762_v50 = vld [vmem:[%s4128_s2 + $0x1f8] sm:$0xff]  ;;  %v2830_v63 = vld [vmem:[%s4133_s7 + $0x8] sm:$0xff]   ;;  %p500_p0 = scmp.lt.s32.totalorder %s2353_s29, 127 }
  0xd7   : > { %2590 = vmatprep.subr.bf16.mxu1 %v2823_v58  ;;  %v860_v46 = vpack.c.bf16 %v827_v40, %v826_v39  ;;  %v761_v49 = vld [vmem:[%s4128_s2 + $0x1f0] sm:$0xff]  ;;  %v2832_v16 = vld [vmem:[%s4133_s7 + $0x18] sm:$0xff]   ;;  %v2834_v42 = vld [vmem:[%s4133_s7 + $0x28] sm:$0xff]  }
  0xd8   : > { %v828_v51 = vsel %vm3230_vm0, %v697_v47, %v761_v49  ;;  %v829_v52 = vsel %vm3230_vm0, %v698_v48, %v762_v50  ;;  %s4162_s29 = smov (!%p500_p0, %s2353_s29), 127 }
  0xd9   : > { %2571 = vmatmul.mubr.bf16.gmra.mrb[16].mxu1 %v855_v55  ;;  %v861_v53 = vpack.c.bf16 %v829_v52, %v828_v51  ;;  %v3721_v55 = vld [vmem:[%s4130_s4] ss:$0 sm:$0xff]  ;;  %s2354_s21 = sshll.u32 %s4162_s29, 3 }
  0xda   : > { %2574 = vmatprep.mubr.bf16.mxu1 %v856_v62  ;;  %2591 = vmatpush3.bf16.msra.mxu1 %v2823_v58  ;;  %v2829_v62 = vld [vmem:[%s4133_s7] sm:$0xff]   ;;  %s3919_s15 = scalar_lea.vmem %s4135_s9, %s2354_s21 }
  0xdb   : > { %2543 = vmatmul.mubr.bf16.gmra.mrb[20].mxu0 %v841_v9  ;;  %v565_v9 = vld [vmem:[%s3197_s17 + $0x1d0] sm:$0xff]  ;;  %2592 = vmatprep.subr.bf16.mxu1 %v2824_v7 }
  0xdc   : > { %2546 = vmatprep.mubr.bf16.mxu0 %v842_v22  ;;  %v823_v22 = vsel %vm3230_vm0, %v692_v6, %v756_v2  ;;  %v693_v27 = vsub.f32 %v565_v9, %v629_v11  ;;  %2666 = vmatprep.subr.bf16.mxu0 %v2829_v62  ;;  %v2831_v6 = vld [vmem:[%s4133_s7 + $0x10] sm:$0xff]  }
  0xdd   : > { %v858_v26 = vpack.c.bf16 %v823_v22, %v822_v21  ;;  %2667 = vmatpush3.bf16.msra.mxu0 %v2829_v62 }
  0xde   : > { %2593 = vmatpush3.bf16.msra.mxu1 %v2824_v7  ;;  %v824_v36 = vsel %vm3230_vm0, %v693_v27, %v757_v29  ;;  %2668 = vmatprep.subr.bf16.mxu0 %v2830_v63 }
  0xdf   : > { %2594 = vmatprep.subr.bf16.mxu1 %v2825_v24  ;;  %v859_v44 = vpack.c.bf16 %v825_v37, %v824_v36 }
  0xe1   : > { %2575 = vmatmul.mubr.bf16.gmra.mrb[20].mxu1 %v857_v23  ;;  %2669 = vmatpush3.bf16.msra.mxu0 %v2830_v63 }
  0xe2   : > { %2578 = vmatprep.mubr.bf16.mxu1 %v858_v26  ;;  %2595 = vmatpush3.bf16.msra.mxu1 %v2825_v24  ;;  %v2833_v24 = vld [vmem:[%s4133_s7 + $0x20] sm:$0xff]  }
  0xe3   : > { %2547 = vmatmul.mubr.bf16.gmra.mrb[24].mxu0 %v843_v54  ;;  %2596 = vmatprep.subr.bf16.mxu1 %v2826_v35  ;;  %v2828_v54 = vld [vmem:[#allocation6 + $0x38] sm:$0xff]  }
  0xe4   : > { %2550 = vmatprep.mubr.bf16.mxu0 %v844_v3  ;;  %2670 = vmatprep.subr.bf16.mxu0 %v2831_v6 }
  0xe5   : > { %2671 = vmatpush3.bf16.msra.mxu0 %v2831_v6 }
  0xe6   : > { %2597 = vmatpush3.bf16.msra.mxu1 %v2826_v35  ;;  %2672 = vmatprep.subr.bf16.mxu0 %v2832_v16 }
  0xe7   : > { %2598 = vmatprep.subr.bf16.mxu1 %v2827_v45 }
  0xe9   : > { %2579 = vmatmul.mubr.bf16.gmra.mrb[24].mxu1 %v859_v44  ;;  %2673 = vmatpush3.bf16.msra.mxu0 %v2832_v16 }
  0xea   : > { %2582 = vmatprep.mubr.bf16.mxu1 %v860_v46  ;;  %2599 = vmatpush3.bf16.msra.mxu1 %v2827_v45 }
  0xeb   : > { %2551 = vmatmul.mubr.bf16.gmra.mrb[28].mxu0 %v845_v25  ;;  %2600 = vmatprep.subr.bf16.mxu1 %v2828_v54 }
  0xec   : > { %2674 = vmatprep.subr.bf16.mxu0 %v2833_v24 }
  0xed   : > { %2675 = vmatpush3.bf16.msra.mxu0 %v2833_v24 }
  0xee   : > { %2601 = vmatpush3.bf16.msra.mxu1 %v2828_v54  ;;  %2676 = vmatprep.subr.bf16.mxu0 %v2834_v42  ;;  %v2835_v54 = vld [vmem:[%s4133_s7 + $0x30] sm:$0xff]  }
  0xf1   : > { %2583 = vmatmul.mubr.bf16.gmra.mrb[28].mxu1 %v861_v53  ;;  %2677 = vmatpush3.bf16.msra.mxu0 %v2834_v42 }
  0xf2   : > { %2678 = vmatprep.subr.bf16.mxu0 %v2835_v54 }
  0xf5   : > { %2679 = vmatpush3.bf16.msra.mxu0 %v2835_v54 }
 0x186   : > { %v2524_v56 = vpop.f32.mrb[0].mxu0 }
 0x187   : > { %v976_v57 = vadd.f32 %v2524_v56, %v3721_v55  ;;  %v967_v58 = vpop.f32.mrb[1].mxu0 }
 0x188   : > { %v968_v59 = vadd.f32 %v3721_v55, %v967_v58  ;;  %v2525_v60 = vpop.f32.mrb[2].mxu0 }
 0x189   : > { %v979_v8 = vadd.f32 %v2525_v60, %v3721_v55  ;;  %v970_v61 = vpop.f32.mrb[3].mxu0  ;;  %v1224_v1 = vmax.f32 %v976_v57, 0.0  ;;  %v2556_v23 = vpop.f32.mrb[0].mxu1 }
 0x18a   : > { %v971_v0 = vadd.f32 %v3721_v55, %v970_v61  ;;  %v1222_v3 = vmax.f32 %v968_v59, 0.0  ;;  %v1104_v27 = vadd.f32 %v2556_v23, %v3721_v55  ;;  %v1095_v28 = vpop.f32.mrb[1].mxu1 }
 0x18b   : > { %v1225_v2 = vmax.f32 %v979_v8, 0.0  ;;  %v1096_v31 = vadd.f32 %v3721_v55, %v1095_v28  ;;  %v2557_v32 = vpop.f32.mrb[2].mxu1 }
 0x18c   : > { %v1223_v4 = vmax.f32 %v971_v0, 0.0  ;;  %v1256_v35 = vmax.f32 %v1104_v27, 0.0  ;;  %v1107_v36 = vadd.f32 %v2557_v32, %v3721_v55  ;;  %v1098_v37 = vpop.f32.mrb[3].mxu1 }
 0x18d   : > { %v1287_v5 = vpack.c.bf16 %v1225_v2, %v1224_v1  ;;  %v1254_v40 = vmax.f32 %v1096_v31, 0.0  ;;  %v1099_v41 = vadd.f32 %v3721_v55, %v1098_v37 }
 0x18e   : > { %v1286_v7 = vpack.c.bf16 %v1223_v4, %v1222_v3  ;;  %v2528_v9 = vpop.f32.mrb[4].mxu0  ;;  %v1257_v44 = vmax.f32 %v1107_v36, 0.0 }
 0x18f   : > { %v992_v10 = vadd.f32 %v2528_v9, %v3721_v55  ;;  %v983_v11 = vpop.f32.mrb[5].mxu0  ;;  %v1255_v47 = vmax.f32 %v1099_v41, 0.0 }
 0x190   : > { %v984_v12 = vadd.f32 %v3721_v55, %v983_v11  ;;  %v2529_v13 = vpop.f32.mrb[6].mxu0  ;;  %2602 = vmatprep.mubr.bf16.mxu1 %v1286_v7  ;;  %v3757_v50 = vpack.c.bf16 %v1257_v44, %v1256_v35 }
 0x191   : > { %v995_v14 = vadd.f32 %v2529_v13, %v3721_v55  ;;  %v986_v15 = vpop.f32.mrb[7].mxu0  ;;  %2603 = vmatmul.mubr.bf16.vlgmr.msra.gmra.mrb[32].mxu1 %v1287_v5  ;;  %v1228_v18 = vmax.f32 %v992_v10, 0.0  ;;  %v3759_v52 = vpack.c.bf16 %v1255_v47, %v1254_v40 }
 0x192   : > { %v987_v17 = vadd.f32 %v3721_v55, %v986_v15  ;;  %v1226_v20 = vmax.f32 %v984_v12, 0.0 }
 0x193   : > { %v1229_v19 = vmax.f32 %v995_v14, 0.0 }
 0x194   : > { %v1227_v21 = vmax.f32 %v987_v17, 0.0  ;;  %v2560_v53 = vpop.f32.mrb[4].mxu1 }
 0x195   : > { %v1289_v22 = vpack.c.bf16 %v1229_v19, %v1228_v18  ;;  %v1120_v58 = vadd.f32 %v2560_v53, %v3721_v55  ;;  %v1111_v59 = vpop.f32.mrb[5].mxu1 }
 0x196   : > { %v1288_v25 = vpack.c.bf16 %v1227_v21, %v1226_v20  ;;  %v2532_v26 = vpop.f32.mrb[8].mxu0  ;;  %v1112_v61 = vadd.f32 %v3721_v55, %v1111_v59  ;;  %v2561_v62 = vpop.f32.mrb[6].mxu1 }
 0x197   : > { %v1008_v29 = vadd.f32 %v2532_v26, %v3721_v55  ;;  %v999_v30 = vpop.f32.mrb[9].mxu0  ;;  %v1260_v1 = vmax.f32 %v1120_v58, 0.0  ;;  %v1123_v2 = vadd.f32 %v2561_v62, %v3721_v55  ;;  %v1114_v3 = vpop.f32.mrb[7].mxu1 }
 0x198   : > { %v1000_v33 = vadd.f32 %v3721_v55, %v999_v30  ;;  %v2533_v34 = vpop.f32.mrb[10].mxu0  ;;  %2606 = vmatprep.mubr.bf16.mxu1 %v1288_v25  ;;  %v1258_v6 = vmax.f32 %v1112_v61, 0.0  ;;  %v1115_v7 = vadd.f32 %v3721_v55, %v1114_v3 }
 0x199   : > { %v1011_v38 = vadd.f32 %v2533_v34, %v3721_v55  ;;  %v1002_v39 = vpop.f32.mrb[11].mxu0  ;;  %2607 = vmatmul.mubr.bf16.gmra.mrb[36].mxu1 %v1289_v22  ;;  %v1232_v45 = vmax.f32 %v1008_v29, 0.0  ;;  %v1261_v10 = vmax.f32 %v1123_v2, 0.0 }
 0x19a   : > { %v1003_v43 = vadd.f32 %v3721_v55, %v1002_v39  ;;  %v1230_v48 = vmax.f32 %v1000_v33, 0.0  ;;  %v1259_v13 = vmax.f32 %v1115_v7, 0.0 }
 0x19b   : > { %v1233_v46 = vmax.f32 %v1011_v38, 0.0  ;;  %v3772_v16 = vpack.c.bf16 %v1261_v10, %v1260_v1 }
 0x19c   : > { %v1231_v49 = vmax.f32 %v1003_v43, 0.0  ;;  %v3774_v18 = vpack.c.bf16 %v1259_v13, %v1258_v6  ;;  %v2564_v19 = vpop.f32.mrb[8].mxu1 }
 0x19d   : > { %v1291_v51 = vpack.c.bf16 %v1233_v46, %v1232_v45  ;;  %v1136_v22 = vadd.f32 %v2564_v19, %v3721_v55  ;;  %v1127_v23 = vpop.f32.mrb[9].mxu1 }
 0x19e   : > { %v1290_v56 = vpack.c.bf16 %v1231_v49, %v1230_v48  ;;  %v2536_v57 = vpop.f32.mrb[12].mxu0  ;;  %v1128_v26 = vadd.f32 %v3721_v55, %v1127_v23  ;;  %v2565_v27 = vpop.f32.mrb[10].mxu1 }
 0x19f   : > { %v1024_v60 = vadd.f32 %v2536_v57, %v3721_v55  ;;  %v1015_v8 = vpop.f32.mrb[13].mxu0  ;;  %v1264_v30 = vmax.f32 %v1136_v22, 0.0  ;;  %v1139_v31 = vadd.f32 %v2565_v27, %v3721_v55  ;;  %v1130_v32 = vpop.f32.mrb[11].mxu1 }
 0x1a0   : > { %v1016_v63 = vadd.f32 %v3721_v55, %v1015_v8  ;;  %v2537_v0 = vpop.f32.mrb[14].mxu0  ;;  %2610 = vmatprep.mubr.bf16.mxu1 %v1290_v56  ;;  %v1262_v35 = vmax.f32 %v1128_v26, 0.0  ;;  %v1131_v36 = vadd.f32 %v3721_v55, %v1130_v32 }
 0x1a1   : > { %v1027_v4 = vadd.f32 %v2537_v0, %v3721_v55  ;;  %v1018_v5 = vpop.f32.mrb[15].mxu0  ;;  %2611 = vmatmul.mubr.bf16.gmra.mrb[40].mxu1 %v1291_v51  ;;  %v1236_v11 = vmax.f32 %v1024_v60, 0.0  ;;  %v1265_v38 = vmax.f32 %v1139_v31, 0.0 }
 0x1a2   : > { %v1019_v9 = vadd.f32 %v3721_v55, %v1018_v5  ;;  %v1234_v14 = vmax.f32 %v1016_v63, 0.0  ;;  %v1263_v41 = vmax.f32 %v1131_v36, 0.0 }
 0x1a3   : > { %v1237_v12 = vmax.f32 %v1027_v4, 0.0  ;;  %v3784_v44 = vpack.c.bf16 %v1265_v38, %v1264_v30 }
 0x1a4   : > { %v1235_v15 = vmax.f32 %v1019_v9, 0.0  ;;  %v3786_v46 = vpack.c.bf16 %v1263_v41, %v1262_v35  ;;  %v2568_v47 = vpop.f32.mrb[12].mxu1 }
 0x1a5   : > { %v1293_v17 = vpack.c.bf16 %v1237_v12, %v1236_v11  ;;  %v1152_v51 = vadd.f32 %v2568_v47, %v3721_v55  ;;  %v1143_v53 = vpop.f32.mrb[13].mxu1 }
 0x1a6   : > { %v1292_v20 = vpack.c.bf16 %v1235_v15, %v1234_v14  ;;  %v2540_v21 = vpop.f32.mrb[16].mxu0  ;;  %v1144_v57 = vadd.f32 %v3721_v55, %v1143_v53  ;;  %v2569_v58 = vpop.f32.mrb[14].mxu1 }
 0x1a7   : > { %v1040_v24 = vadd.f32 %v2540_v21, %v3721_v55  ;;  %v1031_v25 = vpop.f32.mrb[17].mxu0  ;;  %v1268_v8 = vmax.f32 %v1152_v51, 0.0  ;;  %v1155_v61 = vadd.f32 %v2569_v58, %v3721_v55  ;;  %v1146_v62 = vpop.f32.mrb[15].mxu1 }
 0x1a8   : > { %v1032_v28 = vadd.f32 %v3721_v55, %v1031_v25  ;;  %v2541_v29 = vpop.f32.mrb[18].mxu0  ;;  %2614 = vmatprep.mubr.bf16.mxu1 %v1292_v20  ;;  %v1266_v1 = vmax.f32 %v1144_v57, 0.0  ;;  %v1147_v2 = vadd.f32 %v3721_v55, %v1146_v62 }
 0x1a9   : > { %v1043_v33 = vadd.f32 %v2541_v29, %v3721_v55  ;;  %v1034_v34 = vpop.f32.mrb[19].mxu0  ;;  %2615 = vmatmul.mubr.bf16.gmra.mrb[44].mxu1 %v1293_v17  ;;  %v1240_v39 = vmax.f32 %v1040_v24, 0.0  ;;  %v1269_v4 = vmax.f32 %v1155_v61, 0.0 }
 0x1aa   : > { %v1035_v37 = vadd.f32 %v3721_v55, %v1034_v34  ;;  %v1238_v42 = vmax.f32 %v1032_v28, 0.0  ;;  %v1267_v7 = vmax.f32 %v1147_v2, 0.0 }
 0x1ab   : > { %v1241_v40 = vmax.f32 %v1043_v33, 0.0  ;;  %v3796_v11 = vpack.c.bf16 %v1269_v4, %v1268_v8 }
 0x1ac   : > { %v1239_v43 = vmax.f32 %v1035_v37, 0.0  ;;  %v3798_v13 = vpack.c.bf16 %v1267_v7, %v1266_v1  ;;  %v2572_v14 = vpop.f32.mrb[16].mxu1 }
 0x1ad   : > { %v1295_v45 = vpack.c.bf16 %v1241_v40, %v1240_v39  ;;  %v1168_v19 = vadd.f32 %v2572_v14, %v3721_v55  ;;  %v1159_v20 = vpop.f32.mrb[17].mxu1 }
 0x1ae   : > { %v1294_v48 = vpack.c.bf16 %v1239_v43, %v1238_v42  ;;  %v2544_v49 = vpop.f32.mrb[20].mxu0  ;;  %v1160_v23 = vadd.f32 %v3721_v55, %v1159_v20  ;;  %v2573_v24 = vpop.f32.mrb[18].mxu1 }
 0x1af   : > { %v1056_v54 = vadd.f32 %v2544_v49, %v3721_v55  ;;  %v1047_v56 = vpop.f32.mrb[21].mxu0  ;;  %v1272_v27 = vmax.f32 %v1168_v19, 0.0  ;;  %v1171_v28 = vadd.f32 %v2573_v24, %v3721_v55  ;;  %v1162_v29 = vpop.f32.mrb[19].mxu1 }
 0x1b0   : > { %v1048_v59 = vadd.f32 %v3721_v55, %v1047_v56  ;;  %v2545_v60 = vpop.f32.mrb[22].mxu0  ;;  %2618 = vmatprep.mubr.bf16.mxu1 %v1294_v48  ;;  %v1270_v32 = vmax.f32 %v1160_v23, 0.0  ;;  %v1163_v33 = vadd.f32 %v3721_v55, %v1162_v29 }
 0x1b1   : > { %v1059_v63 = vadd.f32 %v2545_v60, %v3721_v55  ;;  %v1050_v0 = vpop.f32.mrb[23].mxu0  ;;  %2619 = vmatmul.mubr.bf16.gmra.mrb[48].mxu1 %v1295_v45  ;;  %v1244_v5 = vmax.f32 %v1056_v54, 0.0  ;;  %v1273_v35 = vmax.f32 %v1171_v28, 0.0 }
 0x1b2   : > { %v1051_v3 = vadd.f32 %v3721_v55, %v1050_v0  ;;  %v1242_v9 = vmax.f32 %v1048_v59, 0.0  ;;  %v1271_v38 = vmax.f32 %v1163_v33, 0.0 }
 0x1b3   : > { %v1245_v6 = vmax.f32 %v1059_v63, 0.0  ;;  %v3808_v41 = vpack.c.bf16 %v1273_v35, %v1272_v27 }
 0x1b4   : > { %v1243_v10 = vmax.f32 %v1051_v3, 0.0  ;;  %v3810_v43 = vpack.c.bf16 %v1271_v38, %v1270_v32  ;;  %v2576_v45 = vpop.f32.mrb[20].mxu1 }
 0x1b5   : > { %v1297_v12 = vpack.c.bf16 %v1245_v6, %v1244_v5  ;;  %v1184_v49 = vadd.f32 %v2576_v45, %v3721_v55  ;;  %v1175_v51 = vpop.f32.mrb[21].mxu1 }
 0x1b6   : > { %v1296_v15 = vpack.c.bf16 %v1243_v10, %v1242_v9  ;;  %v2548_v17 = vpop.f32.mrb[24].mxu0  ;;  %v1176_v56 = vadd.f32 %v3721_v55, %v1175_v51  ;;  %v2577_v57 = vpop.f32.mrb[22].mxu1 }
 0x1b7   : > { %v1072_v21 = vadd.f32 %v2548_v17, %v3721_v55  ;;  %v1063_v22 = vpop.f32.mrb[25].mxu0  ;;  %v1276_v60 = vmax.f32 %v1184_v49, 0.0  ;;  %v1187_v8 = vadd.f32 %v2577_v57, %v3721_v55  ;;  %v1178_v61 = vpop.f32.mrb[23].mxu1 }
 0x1b8   : > { %v1064_v25 = vadd.f32 %v3721_v55, %v1063_v22  ;;  %v2549_v26 = vpop.f32.mrb[26].mxu0  ;;  %2622 = vmatprep.mubr.bf16.mxu1 %v1296_v15  ;;  %v1274_v0 = vmax.f32 %v1176_v56, 0.0  ;;  %v1179_v1 = vadd.f32 %v3721_v55, %v1178_v61 }
 0x1b9   : > { %v1075_v30 = vadd.f32 %v2549_v26, %v3721_v55  ;;  %v1066_v31 = vpop.f32.mrb[27].mxu0  ;;  %2623 = vmatmul.mubr.bf16.gmra.mrb[52].mxu1 %v1297_v12  ;;  %v1248_v36 = vmax.f32 %v1072_v21, 0.0  ;;  %v1277_v3 = vmax.f32 %v1187_v8, 0.0 }
 0x1ba   : > { %v1067_v34 = vadd.f32 %v3721_v55, %v1066_v31  ;;  %v1246_v39 = vmax.f32 %v1064_v25, 0.0  ;;  %v1275_v6 = vmax.f32 %v1179_v1, 0.0 }
 0x1bb   : > { %v1249_v37 = vmax.f32 %v1075_v30, 0.0  ;;  %v1313_v10 = vpack.c.bf16 %v1277_v3, %v1276_v60 }
 0x1bc   : > { %v1247_v40 = vmax.f32 %v1067_v34, 0.0  ;;  %v1312_v14 = vpack.c.bf16 %v1275_v6, %v1274_v0  ;;  %v2580_v15 = vpop.f32.mrb[24].mxu1 }
 0x1bd   : > { %v1299_v42 = vpack.c.bf16 %v1249_v37, %v1248_v36  ;;  %v1200_v19 = vadd.f32 %v2580_v15, %v3721_v55  ;;  %v1191_v20 = vpop.f32.mrb[25].mxu1 }
 0x1be   : > { %v1298_v47 = vpack.c.bf16 %v1247_v40, %v1246_v39  ;;  %v2552_v48 = vpop.f32.mrb[28].mxu0  ;;  %v1192_v21 = vadd.f32 %v3721_v55, %v1191_v20  ;;  %v2581_v22 = vpop.f32.mrb[26].mxu1 }
 0x1bf   : > { %v1088_v53 = vadd.f32 %v2552_v48, %v3721_v55  ;;  %v1079_v54 = vpop.f32.mrb[29].mxu0  ;;  %v1280_v23 = vmax.f32 %v1200_v19, 0.0  ;;  %v1203_v24 = vadd.f32 %v2581_v22, %v3721_v55  ;;  %v1194_v25 = vpop.f32.mrb[27].mxu1 }
 0x1c0   : > { %v1080_v58 = vadd.f32 %v3721_v55, %v1079_v54  ;;  %v2553_v59 = vpop.f32.mrb[30].mxu0  ;;  %2626 = vmatprep.mubr.bf16.mxu1 %v1298_v47  ;;  %v1278_v26 = vmax.f32 %v1192_v21, 0.0  ;;  %v1195_v27 = vadd.f32 %v3721_v55, %v1194_v25 }
 0x1c1   : > { %v1091_v62 = vadd.f32 %v2553_v59, %v3721_v55  ;;  %v1082_v63 = vpop.f32.mrb[31].mxu0  ;;  %2627 = vmatmul.mubr.bf16.gmra.mrb[56].mxu1 %v1299_v42  ;;  %v1252_v4 = vmax.f32 %v1088_v53, 0.0  ;;  %v1281_v28 = vmax.f32 %v1203_v24, 0.0 }
 0x1c2   : > { %v1083_v2 = vadd.f32 %v3721_v55, %v1082_v63  ;;  %v1250_v7 = vmax.f32 %v1080_v58, 0.0  ;;  %v1279_v29 = vmax.f32 %v1195_v27, 0.0 }
 0x1c3   : > { %v1253_v5 = vmax.f32 %v1091_v62, 0.0  ;;  %v1315_v30 = vpack.c.bf16 %v1281_v28, %v1280_v23 }
 0x1c4   : > { %v1251_v9 = vmax.f32 %v1083_v2, 0.0  ;;  %v1314_v31 = vpack.c.bf16 %v1279_v29, %v1278_v26  ;;  %v2584_v32 = vpop.f32.mrb[28].mxu1 }
 0x1c5   : > { %v1301_v12 = vpack.c.bf16 %v1253_v5, %v1252_v4  ;;  %v1216_v33 = vadd.f32 %v2584_v32, %v3721_v55  ;;  %v1207_v34 = vpop.f32.mrb[29].mxu1 }
 0x1c6   : > { %v1300_v17 = vpack.c.bf16 %v1251_v9, %v1250_v7  ;;  %v1208_v35 = vadd.f32 %v3721_v55, %v1207_v34  ;;  %v2585_v36 = vpop.f32.mrb[30].mxu1 }
 0x1c7   : > { %v1284_v37 = vmax.f32 %v1216_v33, 0.0  ;;  %v1219_v38 = vadd.f32 %v2585_v36, %v3721_v55  ;;  %v1210_v39 = vpop.f32.mrb[31].mxu1 }
 0x1c8   : > { %2630 = vmatprep.mubr.bf16.mxu1 %v1300_v17  ;;  %v1282_v40 = vmax.f32 %v1208_v35, 0.0 }
 0x1c9   : > { %2631 = vmatmul.mubr.bf16.gmra.mrb[60].mxu1 %v1301_v12  ;;  %v1285_v42 = vmax.f32 %v1219_v38, 0.0 }
 0x1ca   : > { %2634 = vmatprep.mubr.bf16.mxu1 %v3759_v52  ;;  %v1211_v52 = vadd.f32 %v3721_v55, %v1210_v39  ;;  %v2836_v55 = vld [vmem:[%s4133_s7 + $0x38] sm:$0xff]  }
 0x1cb   : > { %v1317_v47 = vpack.c.bf16 %v1285_v42, %v1284_v37  ;;  %2680 = vmatprep.subr.bf16.mxu0 %v2836_v55 }
 0x1cc   : > { %v1283_v45 = vmax.f32 %v1211_v52, 0.0  ;;  %2681 = vmatpush3.bf16.msra.mxu0 %v2836_v55 }
 0x1ce   : > { %v1316_v48 = vpack.c.bf16 %v1283_v45, %v1282_v40 }
 0x1d1   : > { %2635 = vmatmul.mubr.bf16.gmra.mrb[64].mxu1 %v3757_v50  ;;  %v3844_v50 = vld [vmem:[%s4132_s6] ss:$0 sm:$0xff] }
 0x1d2   : > { %2638 = vmatprep.mubr.bf16.mxu1 %v3774_v18 }
 0x1d9   : > { %2639 = vmatmul.mubr.bf16.gmra.mrb[68].mxu1 %v3772_v16 }
 0x1da   : > { %2642 = vmatprep.mubr.bf16.mxu1 %v3786_v46 }
 0x1e1   : > { %2643 = vmatmul.mubr.bf16.gmra.mrb[72].mxu1 %v3784_v44 }
 0x1e2   : > { %2646 = vmatprep.mubr.bf16.mxu1 %v3798_v13 }
 0x1e9   : > { %2647 = vmatmul.mubr.bf16.gmra.mrb[76].mxu1 %v3796_v11 }
 0x1ea   : > { %2650 = vmatprep.mubr.bf16.mxu1 %v3810_v43 }
 0x1f1   : > { %2651 = vmatmul.mubr.bf16.gmra.mrb[80].mxu1 %v3808_v41 }
 0x1f2   : > { %2654 = vmatprep.mubr.bf16.mxu1 %v1312_v14 }
 0x1f9   : > { %2655 = vmatmul.mubr.bf16.gmra.mrb[84].mxu1 %v1313_v10 }
 0x1fa   : > { %2658 = vmatprep.mubr.bf16.mxu1 %v1314_v31 }
 0x201   : > { %2659 = vmatmul.mubr.bf16.gmra.mrb[88].mxu1 %v1315_v30 }
 0x202   : > { %2662 = vmatprep.mubr.bf16.mxu1 %v1316_v48 }
 0x209   : > { %2663 = vmatmul.mubr.bf16.gmra.mrb[92].mxu1 %v1317_v47 }
 0x264   : > { %v2604_v16 = vpop.f32.mrb[32].mxu1 }
 0x265   : > { %v1432_v18 = vadd.f32 %v2604_v16, %v3844_v50  ;;  %v1423_v44 = vpop.f32.mrb[33].mxu1 }
 0x266   : > { %v1424_v46 = vadd.f32 %v3844_v50, %v1423_v44  ;;  %v2605_v11 = vpop.f32.mrb[34].mxu1 }
 0x267   : > { %v1435_v13 = vadd.f32 %v2605_v11, %v3844_v50  ;;  %v1426_v41 = vpop.f32.mrb[35].mxu1  ;;  %v1680_v49 = vmax.f32 %v1432_v18, 0.0 }
 0x268   : > { %v1427_v43 = vadd.f32 %v3844_v50, %v1426_v41  ;;  %v1678_v53 = vmax.f32 %v1424_v46, 0.0 }
 0x269   : > { %v1681_v51 = vmax.f32 %v1435_v13, 0.0 }
 0x26a   : > { %v1679_v54 = vmax.f32 %v1427_v43, 0.0 }
 0x26b   : > { %v1743_v56 = vpack.c.bf16 %v1681_v51, %v1680_v49 }
 0x26c   : > { %v1742_v57 = vpack.c.bf16 %v1679_v54, %v1678_v53  ;;  %v2608_v58 = vpop.f32.mrb[36].mxu1 }
 0x26d   : > { %v1448_v59 = vadd.f32 %v2608_v58, %v3844_v50  ;;  %v1439_v60 = vpop.f32.mrb[37].mxu1 }
 0x26e   : > { %v1440_v8 = vadd.f32 %v3844_v50, %v1439_v60  ;;  %v2609_v61 = vpop.f32.mrb[38].mxu1  ;;  %2682 = vmatprep.mubr.bf16.mxu0 %v1742_v57 }
 0x26f   : > { %v1451_v62 = vadd.f32 %v2609_v61, %v3844_v50  ;;  %v1442_v63 = vpop.f32.mrb[39].mxu1  ;;  %2683 = vmatmul.mubr.bf16.vlgmr.msra.gmra.mrb[32].mxu0 %v1743_v56  ;;  %v1684_v1 = vmax.f32 %v1448_v59, 0.0 }
 0x270   : > { %v1443_v0 = vadd.f32 %v3844_v50, %v1442_v63  ;;  %v1682_v3 = vmax.f32 %v1440_v8, 0.0 }
 0x271   : > { %v1685_v2 = vmax.f32 %v1451_v62, 0.0 }
 0x272   : > { %v1683_v4 = vmax.f32 %v1443_v0, 0.0 }
 0x273   : > { %v1745_v5 = vpack.c.bf16 %v1685_v2, %v1684_v1 }
 0x274   : > { %v1744_v6 = vpack.c.bf16 %v1683_v4, %v1682_v3  ;;  %v2612_v7 = vpop.f32.mrb[40].mxu1 }
 0x275   : > { %v1464_v9 = vadd.f32 %v2612_v7, %v3844_v50  ;;  %v1455_v10 = vpop.f32.mrb[41].mxu1 }
 0x276   : > { %v1456_v12 = vadd.f32 %v3844_v50, %v1455_v10  ;;  %v2613_v14 = vpop.f32.mrb[42].mxu1  ;;  %2686 = vmatprep.mubr.bf16.mxu0 %v1744_v6 }
 0x277   : > { %v1467_v15 = vadd.f32 %v2613_v14, %v3844_v50  ;;  %v1458_v17 = vpop.f32.mrb[43].mxu1  ;;  %2687 = vmatmul.mubr.bf16.gmra.mrb[36].mxu0 %v1745_v5  ;;  %v1688_v20 = vmax.f32 %v1464_v9, 0.0 }
 0x278   : > { %v1459_v19 = vadd.f32 %v3844_v50, %v1458_v17  ;;  %v1686_v22 = vmax.f32 %v1456_v12, 0.0 }
 0x279   : > { %v1689_v21 = vmax.f32 %v1467_v15, 0.0 }
 0x27a   : > { %v1687_v23 = vmax.f32 %v1459_v19, 0.0 }
 0x27b   : > { %v1747_v24 = vpack.c.bf16 %v1689_v21, %v1688_v20 }
 0x27c   : > { %v1746_v25 = vpack.c.bf16 %v1687_v23, %v1686_v22  ;;  %v2616_v26 = vpop.f32.mrb[44].mxu1 }
 0x27d   : > { %v1480_v27 = vadd.f32 %v2616_v26, %v3844_v50  ;;  %v1471_v28 = vpop.f32.mrb[45].mxu1 }
 0x27e   : > { %v1472_v29 = vadd.f32 %v3844_v50, %v1471_v28  ;;  %v2617_v30 = vpop.f32.mrb[46].mxu1  ;;  %2690 = vmatprep.mubr.bf16.mxu0 %v1746_v25 }
 0x27f   : > { %v1483_v31 = vadd.f32 %v2617_v30, %v3844_v50  ;;  %v1474_v32 = vpop.f32.mrb[47].mxu1  ;;  %2691 = vmatmul.mubr.bf16.gmra.mrb[40].mxu0 %v1747_v24  ;;  %v1692_v34 = vmax.f32 %v1480_v27, 0.0 }
 0x280   : > { %v1475_v33 = vadd.f32 %v3844_v50, %v1474_v32  ;;  %v1690_v36 = vmax.f32 %v1472_v29, 0.0 }
 0x281   : > { %v1693_v35 = vmax.f32 %v1483_v31, 0.0 }
 0x282   : > { %v1691_v37 = vmax.f32 %v1475_v33, 0.0 }
 0x283   : > { %v1749_v38 = vpack.c.bf16 %v1693_v35, %v1692_v34 }
 0x284   : > { %v1748_v39 = vpack.c.bf16 %v1691_v37, %v1690_v36  ;;  %v2620_v40 = vpop.f32.mrb[48].mxu1 }
 0x285   : > { %v1496_v52 = vadd.f32 %v2620_v40, %v3844_v50  ;;  %v1487_v42 = vpop.f32.mrb[49].mxu1 }
 0x286   : > { %v1488_v45 = vadd.f32 %v3844_v50, %v1487_v42  ;;  %v2621_v47 = vpop.f32.mrb[50].mxu1  ;;  %2694 = vmatprep.mubr.bf16.mxu0 %v1748_v39 }
 0x287   : > { %v1499_v48 = vadd.f32 %v2621_v47, %v3844_v50  ;;  %v1490_v55 = vpop.f32.mrb[51].mxu1  ;;  %2695 = vmatmul.mubr.bf16.gmra.mrb[44].mxu0 %v1749_v38  ;;  %v1696_v18 = vmax.f32 %v1496_v52, 0.0 }
 0x288   : > { %v1491_v16 = vadd.f32 %v3844_v50, %v1490_v55  ;;  %v1694_v46 = vmax.f32 %v1488_v45, 0.0 }
 0x289   : > { %v1697_v44 = vmax.f32 %v1499_v48, 0.0 }
 0x28a   : > { %v1695_v11 = vmax.f32 %v1491_v16, 0.0 }
 0x28b   : > { %v1751_v13 = vpack.c.bf16 %v1697_v44, %v1696_v18 }
 0x28c   : > { %v1750_v41 = vpack.c.bf16 %v1695_v11, %v1694_v46  ;;  %v2624_v43 = vpop.f32.mrb[52].mxu1 }
 0x28d   : > { %v1512_v49 = vadd.f32 %v2624_v43, %v3844_v50  ;;  %v1503_v51 = vpop.f32.mrb[53].mxu1 }
 0x28e   : > { %v1504_v53 = vadd.f32 %v3844_v50, %v1503_v51  ;;  %v2625_v54 = vpop.f32.mrb[54].mxu1  ;;  %2698 = vmatprep.mubr.bf16.mxu0 %v1750_v41 }
 0x28f   : > { %v1515_v56 = vadd.f32 %v2625_v54, %v3844_v50  ;;  %v1506_v57 = vpop.f32.mrb[55].mxu1  ;;  %2699 = vmatmul.mubr.bf16.gmra.mrb[48].mxu0 %v1751_v13  ;;  %v1700_v59 = vmax.f32 %v1512_v49, 0.0 }
 0x290   : > { %v1507_v58 = vadd.f32 %v3844_v50, %v1506_v57  ;;  %v1698_v8 = vmax.f32 %v1504_v53, 0.0 }
 0x291   : > { %v1701_v60 = vmax.f32 %v1515_v56, 0.0 }
 0x292   : > { %v1699_v61 = vmax.f32 %v1507_v58, 0.0 }
 0x293   : > { %v1753_v62 = vpack.c.bf16 %v1701_v60, %v1700_v59 }
 0x294   : > { %v1752_v63 = vpack.c.bf16 %v1699_v61, %v1698_v8  ;;  %v2628_v0 = vpop.f32.mrb[56].mxu1 }
 0x295   : > { %v1528_v1 = vadd.f32 %v2628_v0, %v3844_v50  ;;  %v1519_v2 = vpop.f32.mrb[57].mxu1 }
 0x296   : > { %v1520_v3 = vadd.f32 %v3844_v50, %v1519_v2  ;;  %v2629_v4 = vpop.f32.mrb[58].mxu1  ;;  %2702 = vmatprep.mubr.bf16.mxu0 %v1752_v63 }
 0x297   : > { %v1531_v5 = vadd.f32 %v2629_v4, %v3844_v50  ;;  %v1522_v6 = vpop.f32.mrb[59].mxu1  ;;  %2703 = vmatmul.mubr.bf16.gmra.mrb[52].mxu0 %v1753_v62  ;;  %v1704_v9 = vmax.f32 %v1528_v1, 0.0 }
 0x298   : > { %v1523_v7 = vadd.f32 %v3844_v50, %v1522_v6  ;;  %v1702_v12 = vmax.f32 %v1520_v3, 0.0 }
 0x299   : > { %v1705_v10 = vmax.f32 %v1531_v5, 0.0 }
 0x29a   : > { %v1703_v14 = vmax.f32 %v1523_v7, 0.0 }
 0x29b   : > { %v1755_v15 = vpack.c.bf16 %v1705_v10, %v1704_v9 }
 0x29c   : > { %v1754_v17 = vpack.c.bf16 %v1703_v14, %v1702_v12  ;;  %v2632_v19 = vpop.f32.mrb[60].mxu1 }
 0x29d   : > { %v1544_v20 = vadd.f32 %v2632_v19, %v3844_v50  ;;  %v1535_v21 = vpop.f32.mrb[61].mxu1 }
 0x29e   : > { %v1536_v22 = vadd.f32 %v3844_v50, %v1535_v21  ;;  %v2633_v23 = vpop.f32.mrb[62].mxu1  ;;  %2706 = vmatprep.mubr.bf16.mxu0 %v1754_v17 }
 0x29f   : > { %v1547_v24 = vadd.f32 %v2633_v23, %v3844_v50  ;;  %v1538_v25 = vpop.f32.mrb[63].mxu1  ;;  %2707 = vmatmul.mubr.bf16.gmra.mrb[56].mxu0 %v1755_v15  ;;  %v1708_v27 = vmax.f32 %v1544_v20, 0.0 }
 0x2a0   : > { %v1539_v26 = vadd.f32 %v3844_v50, %v1538_v25  ;;  %v1706_v29 = vmax.f32 %v1536_v22, 0.0 }
 0x2a1   : > { %v1709_v28 = vmax.f32 %v1547_v24, 0.0 }
 0x2a2   : > { %v1707_v30 = vmax.f32 %v1539_v26, 0.0 }
 0x2a3   : > { %v1757_v31 = vpack.c.bf16 %v1709_v28, %v1708_v27 }
 0x2a4   : > { %v1756_v32 = vpack.c.bf16 %v1707_v30, %v1706_v29  ;;  %v2636_v33 = vpop.f32.mrb[64].mxu1 }
 0x2a5   : > { %v1560_v34 = vadd.f32 %v2636_v33, %v3844_v50  ;;  %v1551_v35 = vpop.f32.mrb[65].mxu1 }
 0x2a6   : > { %v1552_v36 = vadd.f32 %v3844_v50, %v1551_v35  ;;  %v2637_v37 = vpop.f32.mrb[66].mxu1  ;;  %2710 = vmatprep.mubr.bf16.mxu0 %v1756_v32 }
 0x2a7   : > { %v1563_v38 = vadd.f32 %v2637_v37, %v3844_v50  ;;  %v1554_v39 = vpop.f32.mrb[67].mxu1  ;;  %2711 = vmatmul.mubr.bf16.gmra.mrb[60].mxu0 %v1757_v31  ;;  %v1712_v52 = vmax.f32 %v1560_v34, 0.0 }
 0x2a8   : > { %v1555_v40 = vadd.f32 %v3844_v50, %v1554_v39  ;;  %v1710_v45 = vmax.f32 %v1552_v36, 0.0 }
 0x2a9   : > { %v1713_v42 = vmax.f32 %v1563_v38, 0.0 }
 0x2aa   : > { %v1711_v47 = vmax.f32 %v1555_v40, 0.0 }
 0x2ab   : > { %v1759_v48 = vpack.c.bf16 %v1713_v42, %v1712_v52 }
 0x2ac   : > { %v1758_v55 = vpack.c.bf16 %v1711_v47, %v1710_v45  ;;  %v2640_v16 = vpop.f32.mrb[68].mxu1 }
 0x2ad   : > { %v1576_v18 = vadd.f32 %v2640_v16, %v3844_v50  ;;  %v1567_v44 = vpop.f32.mrb[69].mxu1 }
 0x2ae   : > { %v1568_v46 = vadd.f32 %v3844_v50, %v1567_v44  ;;  %v2641_v11 = vpop.f32.mrb[70].mxu1  ;;  %2714 = vmatprep.mubr.bf16.mxu0 %v1758_v55 }
 0x2af   : > { %v1579_v13 = vadd.f32 %v2641_v11, %v3844_v50  ;;  %v1570_v41 = vpop.f32.mrb[71].mxu1  ;;  %2715 = vmatmul.mubr.bf16.gmra.mrb[64].mxu0 %v1759_v48  ;;  %v1716_v49 = vmax.f32 %v1576_v18, 0.0 }
 0x2b0   : > { %v1571_v43 = vadd.f32 %v3844_v50, %v1570_v41  ;;  %v1714_v53 = vmax.f32 %v1568_v46, 0.0 }
 0x2b1   : > { %v1717_v51 = vmax.f32 %v1579_v13, 0.0 }
 0x2b2   : > { %v1715_v54 = vmax.f32 %v1571_v43, 0.0 }
 0x2b3   : > { %v1761_v56 = vpack.c.bf16 %v1717_v51, %v1716_v49 }
 0x2b4   : > { %v1760_v57 = vpack.c.bf16 %v1715_v54, %v1714_v53  ;;  %v2644_v58 = vpop.f32.mrb[72].mxu1 }
 0x2b5   : > { %v1592_v59 = vadd.f32 %v2644_v58, %v3844_v50  ;;  %v1583_v60 = vpop.f32.mrb[73].mxu1 }
 0x2b6   : > { %v1584_v8 = vadd.f32 %v3844_v50, %v1583_v60  ;;  %v2645_v61 = vpop.f32.mrb[74].mxu1  ;;  %2718 = vmatprep.mubr.bf16.mxu0 %v1760_v57 }
 0x2b7   : > { %v1595_v62 = vadd.f32 %v2645_v61, %v3844_v50  ;;  %v1586_v63 = vpop.f32.mrb[75].mxu1  ;;  %2719 = vmatmul.mubr.bf16.gmra.mrb[68].mxu0 %v1761_v56  ;;  %v1720_v1 = vmax.f32 %v1592_v59, 0.0 }
 0x2b8   : > { %v1587_v0 = vadd.f32 %v3844_v50, %v1586_v63  ;;  %v1718_v3 = vmax.f32 %v1584_v8, 0.0 }
 0x2b9   : > { %v1721_v2 = vmax.f32 %v1595_v62, 0.0 }
 0x2ba   : > { %v1719_v4 = vmax.f32 %v1587_v0, 0.0 }
 0x2bb   : > { %v1763_v5 = vpack.c.bf16 %v1721_v2, %v1720_v1 }
 0x2bc   : > { %v1762_v6 = vpack.c.bf16 %v1719_v4, %v1718_v3  ;;  %v2648_v7 = vpop.f32.mrb[76].mxu1 }
 0x2bd   : > { %v1608_v9 = vadd.f32 %v2648_v7, %v3844_v50  ;;  %v1599_v10 = vpop.f32.mrb[77].mxu1 }
 0x2be   : > { %v1600_v12 = vadd.f32 %v3844_v50, %v1599_v10  ;;  %v2649_v14 = vpop.f32.mrb[78].mxu1  ;;  %2722 = vmatprep.mubr.bf16.mxu0 %v1762_v6 }
 0x2bf   : > { %v1611_v15 = vadd.f32 %v2649_v14, %v3844_v50  ;;  %v1602_v17 = vpop.f32.mrb[79].mxu1  ;;  %2723 = vmatmul.mubr.bf16.gmra.mrb[72].mxu0 %v1763_v5  ;;  %v1724_v20 = vmax.f32 %v1608_v9, 0.0 }
 0x2c0   : > { %v1603_v19 = vadd.f32 %v3844_v50, %v1602_v17  ;;  %v1722_v22 = vmax.f32 %v1600_v12, 0.0 }
 0x2c1   : > { %v1725_v21 = vmax.f32 %v1611_v15, 0.0 }
 0x2c2   : > { %v1723_v23 = vmax.f32 %v1603_v19, 0.0  ;;  %v3914_v19 = vld [vmem:[%s4134_s8] ss:$0 sm:$0xff] }
 0x2c3   : > { %v1765_v24 = vpack.c.bf16 %v1725_v21, %v1724_v20 }
 0x2c4   : > { %v1764_v25 = vpack.c.bf16 %v1723_v23, %v1722_v22  ;;  %v2652_v26 = vpop.f32.mrb[80].mxu1 }
 0x2c5   : > { %v1624_v27 = vadd.f32 %v2652_v26, %v3844_v50  ;;  %v1615_v28 = vpop.f32.mrb[81].mxu1 }
 0x2c6   : > { %v1616_v29 = vadd.f32 %v3844_v50, %v1615_v28  ;;  %v2653_v30 = vpop.f32.mrb[82].mxu1  ;;  %2726 = vmatprep.mubr.bf16.mxu0 %v1764_v25 }
 0x2c7   : > { %v1627_v31 = vadd.f32 %v2653_v30, %v3844_v50  ;;  %v1618_v32 = vpop.f32.mrb[83].mxu1  ;;  %2727 = vmatmul.mubr.bf16.gmra.mrb[76].mxu0 %v1765_v24  ;;  %v1728_v34 = vmax.f32 %v1624_v27, 0.0 }
 0x2c8   : > { %v1619_v33 = vadd.f32 %v3844_v50, %v1618_v32  ;;  %v1726_v36 = vmax.f32 %v1616_v29, 0.0 }
 0x2c9   : > { %v1729_v35 = vmax.f32 %v1627_v31, 0.0 }
 0x2ca   : > { %v1727_v37 = vmax.f32 %v1619_v33, 0.0 }
 0x2cb   : > { %v1767_v38 = vpack.c.bf16 %v1729_v35, %v1728_v34 }
 0x2cc   : > { %v1766_v39 = vpack.c.bf16 %v1727_v37, %v1726_v36  ;;  %v2656_v40 = vpop.f32.mrb[84].mxu1 }
 0x2cd   : > { %v1640_v52 = vadd.f32 %v2656_v40, %v3844_v50  ;;  %v1631_v42 = vpop.f32.mrb[85].mxu1 }
 0x2ce   : > { %v1632_v45 = vadd.f32 %v3844_v50, %v1631_v42  ;;  %v2657_v47 = vpop.f32.mrb[86].mxu1  ;;  %2730 = vmatprep.mubr.bf16.mxu0 %v1766_v39 }
 0x2cf   : > { %v1643_v48 = vadd.f32 %v2657_v47, %v3844_v50  ;;  %v1634_v55 = vpop.f32.mrb[87].mxu1  ;;  %2731 = vmatmul.mubr.bf16.gmra.mrb[80].mxu0 %v1767_v38  ;;  %v1732_v18 = vmax.f32 %v1640_v52, 0.0 }
 0x2d0   : > { %v1635_v16 = vadd.f32 %v3844_v50, %v1634_v55  ;;  %v1730_v46 = vmax.f32 %v1632_v45, 0.0 }
 0x2d1   : > { %v1733_v44 = vmax.f32 %v1643_v48, 0.0 }
 0x2d2   : > { %v1731_v11 = vmax.f32 %v1635_v16, 0.0 }
 0x2d3   : > { %v1769_v13 = vpack.c.bf16 %v1733_v44, %v1732_v18 }
 0x2d4   : > { %v1768_v41 = vpack.c.bf16 %v1731_v11, %v1730_v46  ;;  %v2660_v43 = vpop.f32.mrb[88].mxu1 }
 0x2d5   : > { %v1656_v49 = vadd.f32 %v2660_v43, %v3844_v50  ;;  %v1647_v51 = vpop.f32.mrb[89].mxu1 }
 0x2d6   : > { %v1648_v53 = vadd.f32 %v3844_v50, %v1647_v51  ;;  %v2661_v54 = vpop.f32.mrb[90].mxu1  ;;  %2734 = vmatprep.mubr.bf16.mxu0 %v1768_v41 }
 0x2d7   : > { %v1659_v56 = vadd.f32 %v2661_v54, %v3844_v50  ;;  %v1650_v57 = vpop.f32.mrb[91].mxu1  ;;  %2735 = vmatmul.mubr.bf16.gmra.mrb[84].mxu0 %v1769_v13  ;;  %v1736_v59 = vmax.f32 %v1656_v49, 0.0 }
 0x2d8   : > { %v1651_v58 = vadd.f32 %v3844_v50, %v1650_v57  ;;  %v1734_v8 = vmax.f32 %v1648_v53, 0.0 }
 0x2d9   : > { %v1737_v60 = vmax.f32 %v1659_v56, 0.0 }
 0x2da   : > { %v1735_v61 = vmax.f32 %v1651_v58, 0.0 }
 0x2db   : > { %v1771_v62 = vpack.c.bf16 %v1737_v60, %v1736_v59 }
 0x2dc   : > { %v1770_v63 = vpack.c.bf16 %v1735_v61, %v1734_v8  ;;  %v2664_v0 = vpop.f32.mrb[92].mxu1 }
 0x2dd   : > { %v1672_v1 = vadd.f32 %v2664_v0, %v3844_v50  ;;  %v1663_v2 = vpop.f32.mrb[93].mxu1 }
 0x2de   : > { %v1664_v3 = vadd.f32 %v3844_v50, %v1663_v2  ;;  %v2665_v4 = vpop.f32.mrb[94].mxu1  ;;  %2738 = vmatprep.mubr.bf16.mxu0 %v1770_v63 }
 0x2df   : > { %v1675_v5 = vadd.f32 %v2665_v4, %v3844_v50  ;;  %v1666_v6 = vpop.f32.mrb[95].mxu1  ;;  %2739 = vmatmul.mubr.bf16.gmra.mrb[88].mxu0 %v1771_v62  ;;  %v1740_v9 = vmax.f32 %v1672_v1, 0.0 }
 0x2e0   : > { %v1667_v7 = vadd.f32 %v3844_v50, %v1666_v6  ;;  %v1738_v12 = vmax.f32 %v1664_v3, 0.0 }
 0x2e1   : > { %v1741_v10 = vmax.f32 %v1675_v5, 0.0 }
 0x2e2   : > { %v1739_v14 = vmax.f32 %v1667_v7, 0.0 }
 0x2e3   : > { %v1773_v15 = vpack.c.bf16 %v1741_v10, %v1740_v9 }
 0x2e4   : > { %v1772_v17 = vpack.c.bf16 %v1739_v14, %v1738_v12 }
 0x2e6   : > { %2742 = vmatprep.mubr.bf16.mxu0 %v1772_v17 }
 0x2e7   : > { %2743 = vmatmul.mubr.bf16.gmra.mrb[92].mxu0 %v1773_v15 }
 0x342   : > { %v2684_v50 = vpop.f32.mrb[32].mxu0 }
 0x343   : > { %v1888_v20 = vadd.f32 %v2684_v50, %v3914_v19  ;;  %v1879_v21 = vpop.f32.mrb[33].mxu0 }
 0x344   : > { %v1880_v22 = vadd.f32 %v3914_v19, %v1879_v21  ;;  %v2685_v23 = vpop.f32.mrb[34].mxu0 }
 0x345   : > { %2137 = vst.msk [vmem:[%s3919_s15 + $0x10] sm:$0xff] %vm2134_vm1, %v1888_v20  ;;  %v1891_v24 = vadd.f32 %v2685_v23, %v3914_v19  ;;  %v1882_v25 = vpop.f32.mrb[35].mxu0 }
 0x346   : > { %2135 = vst.msk [vmem:[%s3919_s15] sm:$0xff] %vm2134_vm1, %v1880_v22  ;;  %v1883_v26 = vadd.f32 %v3914_v19, %v1882_v25 }
 0x347   : > { %2138 = vst.msk [vmem:[%s3919_s15 + $0x18] sm:$0xff] %vm2134_vm1, %v1891_v24 }
 0x348   : > { %2136 = vst.msk [vmem:[%s3919_s15 + $0x8] sm:$0xff] %vm2134_vm1, %v1883_v26 }
 0x34a   : > { %v2688_v27 = vpop.f32.mrb[36].mxu0 }
 0x34b   : > { %v1904_v28 = vadd.f32 %v2688_v27, %v3914_v19  ;;  %v1895_v29 = vpop.f32.mrb[37].mxu0 }
 0x34c   : > { %v1896_v30 = vadd.f32 %v3914_v19, %v1895_v29  ;;  %v2689_v31 = vpop.f32.mrb[38].mxu0 }
 0x34d   : > { %2141 = vst.msk [vmem:[%s3919_s15 + $0x30] sm:$0xff] %vm2134_vm1, %v1904_v28  ;;  %v1907_v32 = vadd.f32 %v2689_v31, %v3914_v19  ;;  %v1898_v33 = vpop.f32.mrb[39].mxu0 }
 0x34e   : > { %2139 = vst.msk [vmem:[%s3919_s15 + $0x20] sm:$0xff] %vm2134_vm1, %v1896_v30  ;;  %v1899_v34 = vadd.f32 %v3914_v19, %v1898_v33 }
 0x34f   : > { %2142 = vst.msk [vmem:[%s3919_s15 + $0x38] sm:$0xff] %vm2134_vm1, %v1907_v32 }
 0x350   : > { %2140 = vst.msk [vmem:[%s3919_s15 + $0x28] sm:$0xff] %vm2134_vm1, %v1899_v34 }
 0x352   : > { %v2692_v35 = vpop.f32.mrb[40].mxu0 }
 0x353   : > { %v1920_v36 = vadd.f32 %v2692_v35, %v3914_v19  ;;  %v1911_v37 = vpop.f32.mrb[41].mxu0 }
 0x354   : > { %v1912_v38 = vadd.f32 %v3914_v19, %v1911_v37  ;;  %v2693_v39 = vpop.f32.mrb[42].mxu0 }
 0x355   : > { %2145 = vst.msk [vmem:[%s3919_s15 + $0x50] sm:$0xff] %vm2134_vm1, %v1920_v36  ;;  %v1923_v40 = vadd.f32 %v2693_v39, %v3914_v19  ;;  %v1914_v52 = vpop.f32.mrb[43].mxu0 }
 0x356   : > { %2143 = vst.msk [vmem:[%s3919_s15 + $0x40] sm:$0xff] %vm2134_vm1, %v1912_v38  ;;  %v1915_v42 = vadd.f32 %v3914_v19, %v1914_v52 }
 0x357   : > { %2146 = vst.msk [vmem:[%s3919_s15 + $0x58] sm:$0xff] %vm2134_vm1, %v1923_v40 }
 0x358   : > { %2144 = vst.msk [vmem:[%s3919_s15 + $0x48] sm:$0xff] %vm2134_vm1, %v1915_v42 }
 0x35a   : > { %v2696_v45 = vpop.f32.mrb[44].mxu0 }
 0x35b   : > { %v1936_v47 = vadd.f32 %v2696_v45, %v3914_v19  ;;  %v1927_v48 = vpop.f32.mrb[45].mxu0 }
 0x35c   : > { %v1928_v55 = vadd.f32 %v3914_v19, %v1927_v48  ;;  %v2697_v16 = vpop.f32.mrb[46].mxu0 }
 0x35d   : > { %2149 = vst.msk [vmem:[%s3919_s15 + $0x70] sm:$0xff] %vm2134_vm1, %v1936_v47  ;;  %v1939_v18 = vadd.f32 %v2697_v16, %v3914_v19  ;;  %v1930_v44 = vpop.f32.mrb[47].mxu0 }
 0x35e   : > { %2147 = vst.msk [vmem:[%s3919_s15 + $0x60] sm:$0xff] %vm2134_vm1, %v1928_v55  ;;  %v1931_v46 = vadd.f32 %v3914_v19, %v1930_v44 }
 0x35f   : > { %2150 = vst.msk [vmem:[%s3919_s15 + $0x78] sm:$0xff] %vm2134_vm1, %v1939_v18 }
 0x360   : > { %2148 = vst.msk [vmem:[%s3919_s15 + $0x68] sm:$0xff] %vm2134_vm1, %v1931_v46 }
 0x362   : > { %v2700_v11 = vpop.f32.mrb[48].mxu0 }
 0x363   : > { %v1952_v13 = vadd.f32 %v2700_v11, %v3914_v19  ;;  %v1943_v41 = vpop.f32.mrb[49].mxu0 }
 0x364   : > { %v1944_v43 = vadd.f32 %v3914_v19, %v1943_v41  ;;  %v2701_v49 = vpop.f32.mrb[50].mxu0 }
 0x365   : > { %2153 = vst.msk [vmem:[%s3919_s15 + $0x90] sm:$0xff] %vm2134_vm1, %v1952_v13  ;;  %v1955_v51 = vadd.f32 %v2701_v49, %v3914_v19  ;;  %v1946_v53 = vpop.f32.mrb[51].mxu0 }
 0x366   : > { %2151 = vst.msk [vmem:[%s3919_s15 + $0x80] sm:$0xff] %vm2134_vm1, %v1944_v43  ;;  %v1947_v54 = vadd.f32 %v3914_v19, %v1946_v53 }
 0x367   : > { %2154 = vst.msk [vmem:[%s3919_s15 + $0x98] sm:$0xff] %vm2134_vm1, %v1955_v51 }
 0x368   : > { %2152 = vst.msk [vmem:[%s3919_s15 + $0x88] sm:$0xff] %vm2134_vm1, %v1947_v54 }
 0x36a   : > { %v2704_v56 = vpop.f32.mrb[52].mxu0 }
 0x36b   : > { %v1968_v57 = vadd.f32 %v2704_v56, %v3914_v19  ;;  %v1959_v58 = vpop.f32.mrb[53].mxu0 }
 0x36c   : > { %v1960_v59 = vadd.f32 %v3914_v19, %v1959_v58  ;;  %v2705_v60 = vpop.f32.mrb[54].mxu0 }
 0x36d   : > { %2157 = vst.msk [vmem:[%s3919_s15 + $0xb0] sm:$0xff] %vm2134_vm1, %v1968_v57  ;;  %v1971_v8 = vadd.f32 %v2705_v60, %v3914_v19  ;;  %v1962_v61 = vpop.f32.mrb[55].mxu0 }
 0x36e   : > { %2155 = vst.msk [vmem:[%s3919_s15 + $0xa0] sm:$0xff] %vm2134_vm1, %v1960_v59  ;;  %v1963_v62 = vadd.f32 %v3914_v19, %v1962_v61 }
 0x36f   : > { %2158 = vst.msk [vmem:[%s3919_s15 + $0xb8] sm:$0xff] %vm2134_vm1, %v1971_v8 }
 0x370   : > { %2156 = vst.msk [vmem:[%s3919_s15 + $0xa8] sm:$0xff] %vm2134_vm1, %v1963_v62 }
 0x372   : > { %v2708_v63 = vpop.f32.mrb[56].mxu0 }
 0x373   : > { %v1984_v0 = vadd.f32 %v2708_v63, %v3914_v19  ;;  %v1975_v1 = vpop.f32.mrb[57].mxu0 }
 0x374   : > { %v1976_v2 = vadd.f32 %v3914_v19, %v1975_v1  ;;  %v2709_v3 = vpop.f32.mrb[58].mxu0 }
 0x375   : > { %2161 = vst.msk [vmem:[%s3919_s15 + $0xd0] sm:$0xff] %vm2134_vm1, %v1984_v0  ;;  %v1987_v4 = vadd.f32 %v2709_v3, %v3914_v19  ;;  %v1978_v5 = vpop.f32.mrb[59].mxu0 }
 0x376   : > { %2159 = vst.msk [vmem:[%s3919_s15 + $0xc0] sm:$0xff] %vm2134_vm1, %v1976_v2  ;;  %v1979_v6 = vadd.f32 %v3914_v19, %v1978_v5 }
 0x377   : > { %2162 = vst.msk [vmem:[%s3919_s15 + $0xd8] sm:$0xff] %vm2134_vm1, %v1987_v4 }
 0x378   : > { %2160 = vst.msk [vmem:[%s3919_s15 + $0xc8] sm:$0xff] %vm2134_vm1, %v1979_v6 }
 0x37a   : > { %v2712_v7 = vpop.f32.mrb[60].mxu0 }
 0x37b   : > { %v2000_v9 = vadd.f32 %v2712_v7, %v3914_v19  ;;  %v1991_v10 = vpop.f32.mrb[61].mxu0 }
 0x37c   : > { %v1992_v12 = vadd.f32 %v3914_v19, %v1991_v10  ;;  %v2713_v14 = vpop.f32.mrb[62].mxu0 }
 0x37d   : > { %2165 = vst.msk [vmem:[%s3919_s15 + $0xf0] sm:$0xff] %vm2134_vm1, %v2000_v9  ;;  %v2003_v15 = vadd.f32 %v2713_v14, %v3914_v19  ;;  %v1994_v17 = vpop.f32.mrb[63].mxu0 }
 0x37e   : > { %2163 = vst.msk [vmem:[%s3919_s15 + $0xe0] sm:$0xff] %vm2134_vm1, %v1992_v12  ;;  %v1995_v50 = vadd.f32 %v3914_v19, %v1994_v17 }
 0x37f   : > { %2166 = vst.msk [vmem:[%s3919_s15 + $0xf8] sm:$0xff] %vm2134_vm1, %v2003_v15 }
 0x380   : > { %2164 = vst.msk [vmem:[%s3919_s15 + $0xe8] sm:$0xff] %vm2134_vm1, %v1995_v50 }
 0x382   : > { %v2716_v20 = vpop.f32.mrb[64].mxu0 }
 0x383   : > { %v2016_v21 = vadd.f32 %v2716_v20, %v3914_v19  ;;  %v2007_v22 = vpop.f32.mrb[65].mxu0 }
 0x384   : > { %v2008_v23 = vadd.f32 %v3914_v19, %v2007_v22  ;;  %v2717_v24 = vpop.f32.mrb[66].mxu0 }
 0x385   : > { %2169 = vst.msk [vmem:[%s3919_s15 + $0x110] sm:$0xff] %vm2134_vm1, %v2016_v21  ;;  %v2019_v25 = vadd.f32 %v2717_v24, %v3914_v19  ;;  %v2010_v26 = vpop.f32.mrb[67].mxu0 }
 0x386   : > { %2167 = vst.msk [vmem:[%s3919_s15 + $0x100] sm:$0xff] %vm2134_vm1, %v2008_v23  ;;  %v2011_v27 = vadd.f32 %v3914_v19, %v2010_v26 }
 0x387   : > { %2170 = vst.msk [vmem:[%s3919_s15 + $0x118] sm:$0xff] %vm2134_vm1, %v2019_v25 }
 0x388   : > { %2168 = vst.msk [vmem:[%s3919_s15 + $0x108] sm:$0xff] %vm2134_vm1, %v2011_v27 }
 0x38a   : > { %v2720_v28 = vpop.f32.mrb[68].mxu0 }
 0x38b   : > { %v2032_v29 = vadd.f32 %v2720_v28, %v3914_v19  ;;  %v2023_v30 = vpop.f32.mrb[69].mxu0 }
 0x38c   : > { %v2024_v31 = vadd.f32 %v3914_v19, %v2023_v30  ;;  %v2721_v32 = vpop.f32.mrb[70].mxu0 }
 0x38d   : > { %2173 = vst.msk [vmem:[%s3919_s15 + $0x130] sm:$0xff] %vm2134_vm1, %v2032_v29  ;;  %v2035_v33 = vadd.f32 %v2721_v32, %v3914_v19  ;;  %v2026_v34 = vpop.f32.mrb[71].mxu0 }
 0x38e   : > { %2171 = vst.msk [vmem:[%s3919_s15 + $0x120] sm:$0xff] %vm2134_vm1, %v2024_v31  ;;  %v2027_v35 = vadd.f32 %v3914_v19, %v2026_v34 }
 0x38f   : > { %2174 = vst.msk [vmem:[%s3919_s15 + $0x138] sm:$0xff] %vm2134_vm1, %v2035_v33 }
 0x390   : > { %2172 = vst.msk [vmem:[%s3919_s15 + $0x128] sm:$0xff] %vm2134_vm1, %v2027_v35 }
 0x392   : > { %v2724_v36 = vpop.f32.mrb[72].mxu0 }
 0x393   : > { %v2048_v37 = vadd.f32 %v2724_v36, %v3914_v19  ;;  %v2039_v38 = vpop.f32.mrb[73].mxu0 }
 0x394   : > { %v2040_v39 = vadd.f32 %v3914_v19, %v2039_v38  ;;  %v2725_v40 = vpop.f32.mrb[74].mxu0 }
 0x395   : > { %2177 = vst.msk [vmem:[%s3919_s15 + $0x150] sm:$0xff] %vm2134_vm1, %v2048_v37  ;;  %v2051_v52 = vadd.f32 %v2725_v40, %v3914_v19  ;;  %v2042_v42 = vpop.f32.mrb[75].mxu0 }
 0x396   : > { %2175 = vst.msk [vmem:[%s3919_s15 + $0x140] sm:$0xff] %vm2134_vm1, %v2040_v39  ;;  %v2043_v45 = vadd.f32 %v3914_v19, %v2042_v42 }
 0x397   : > { %2178 = vst.msk [vmem:[%s3919_s15 + $0x158] sm:$0xff] %vm2134_vm1, %v2051_v52 }
 0x398   : > { %2176 = vst.msk [vmem:[%s3919_s15 + $0x148] sm:$0xff] %vm2134_vm1, %v2043_v45 }
 0x39a   : > { %v2728_v47 = vpop.f32.mrb[76].mxu0 }
 0x39b   : > { %v2064_v48 = vadd.f32 %v2728_v47, %v3914_v19  ;;  %v2055_v55 = vpop.f32.mrb[77].mxu0 }
 0x39c   : > { %v2056_v16 = vadd.f32 %v3914_v19, %v2055_v55  ;;  %v2729_v18 = vpop.f32.mrb[78].mxu0 }
 0x39d   : > { %2181 = vst.msk [vmem:[%s3919_s15 + $0x170] sm:$0xff] %vm2134_vm1, %v2064_v48  ;;  %v2067_v44 = vadd.f32 %v2729_v18, %v3914_v19  ;;  %v2058_v46 = vpop.f32.mrb[79].mxu0 }
 0x39e   : > { %2179 = vst.msk [vmem:[%s3919_s15 + $0x160] sm:$0xff] %vm2134_vm1, %v2056_v16  ;;  %v2059_v11 = vadd.f32 %v3914_v19, %v2058_v46 }
 0x39f   : > { %2182 = vst.msk [vmem:[%s3919_s15 + $0x178] sm:$0xff] %vm2134_vm1, %v2067_v44 }
 0x3a0   : > { %2180 = vst.msk [vmem:[%s3919_s15 + $0x168] sm:$0xff] %vm2134_vm1, %v2059_v11 }
 0x3a2   : > { %v2732_v13 = vpop.f32.mrb[80].mxu0 }
 0x3a3   : > { %v2080_v41 = vadd.f32 %v2732_v13, %v3914_v19  ;;  %v2071_v43 = vpop.f32.mrb[81].mxu0 }
 0x3a4   : > { %v2072_v49 = vadd.f32 %v3914_v19, %v2071_v43  ;;  %v2733_v51 = vpop.f32.mrb[82].mxu0 }
 0x3a5   : > { %2185 = vst.msk [vmem:[%s3919_s15 + $0x190] sm:$0xff] %vm2134_vm1, %v2080_v41  ;;  %v2083_v53 = vadd.f32 %v2733_v51, %v3914_v19  ;;  %v2074_v54 = vpop.f32.mrb[83].mxu0 }
 0x3a6   : > { %2183 = vst.msk [vmem:[%s3919_s15 + $0x180] sm:$0xff] %vm2134_vm1, %v2072_v49  ;;  %v2075_v56 = vadd.f32 %v3914_v19, %v2074_v54 }
 0x3a7   : > { %2186 = vst.msk [vmem:[%s3919_s15 + $0x198] sm:$0xff] %vm2134_vm1, %v2083_v53 }
 0x3a8   : > { %2184 = vst.msk [vmem:[%s3919_s15 + $0x188] sm:$0xff] %vm2134_vm1, %v2075_v56 }
 0x3aa   : > { %v2736_v57 = vpop.f32.mrb[84].mxu0 }
 0x3ab   : > { %v2096_v58 = vadd.f32 %v2736_v57, %v3914_v19  ;;  %v2087_v59 = vpop.f32.mrb[85].mxu0 }
 0x3ac   : > { %v2088_v60 = vadd.f32 %v3914_v19, %v2087_v59  ;;  %v2737_v8 = vpop.f32.mrb[86].mxu0 }
 0x3ad   : > { %2189 = vst.msk [vmem:[%s3919_s15 + $0x1b0] sm:$0xff] %vm2134_vm1, %v2096_v58  ;;  %v2099_v61 = vadd.f32 %v2737_v8, %v3914_v19  ;;  %v2090_v62 = vpop.f32.mrb[87].mxu0 }
 0x3ae   : > { %2187 = vst.msk [vmem:[%s3919_s15 + $0x1a0] sm:$0xff] %vm2134_vm1, %v2088_v60  ;;  %v2091_v63 = vadd.f32 %v3914_v19, %v2090_v62 }
 0x3af   : > { %2190 = vst.msk [vmem:[%s3919_s15 + $0x1b8] sm:$0xff] %vm2134_vm1, %v2099_v61 }
 0x3b0   : > { %2188 = vst.msk [vmem:[%s3919_s15 + $0x1a8] sm:$0xff] %vm2134_vm1, %v2091_v63 }
 0x3b2   : > { %v2740_v0 = vpop.f32.mrb[88].mxu0 }
 0x3b3   : > { %v2112_v1 = vadd.f32 %v2740_v0, %v3914_v19  ;;  %v2103_v2 = vpop.f32.mrb[89].mxu0 }
 0x3b4   : > { %v2104_v3 = vadd.f32 %v3914_v19, %v2103_v2  ;;  %v2741_v4 = vpop.f32.mrb[90].mxu0 }
 0x3b5   : > { %2193 = vst.msk [vmem:[%s3919_s15 + $0x1d0] sm:$0xff] %vm2134_vm1, %v2112_v1  ;;  %v2115_v5 = vadd.f32 %v2741_v4, %v3914_v19  ;;  %v2106_v6 = vpop.f32.mrb[91].mxu0 }
 0x3b6   : > { %2191 = vst.msk [vmem:[%s3919_s15 + $0x1c0] sm:$0xff] %vm2134_vm1, %v2104_v3  ;;  %v2107_v7 = vadd.f32 %v3914_v19, %v2106_v6 }
 0x3b7   : > { %2194 = vst.msk [vmem:[%s3919_s15 + $0x1d8] sm:$0xff] %vm2134_vm1, %v2115_v5 }
 0x3b8   : > { %2192 = vst.msk [vmem:[%s3919_s15 + $0x1c8] sm:$0xff] %vm2134_vm1, %v2107_v7 }
 0x3ba   : > { %v2744_v9 = vpop.f32.mrb[92].mxu0 }
 0x3bb   : > { %v2128_v10 = vadd.f32 %v2744_v9, %v3914_v19  ;;  %v2119_v12 = vpop.f32.mrb[93].mxu0 }
 0x3bc   : > { %v2120_v14 = vadd.f32 %v3914_v19, %v2119_v12  ;;  %v2745_v15 = vpop.f32.mrb[94].mxu0 }
 0x3bd   : > { %2197 = vst.msk [vmem:[%s3919_s15 + $0x1f0] sm:$0xff] %vm2134_vm1, %v2128_v10  ;;  %v2131_v17 = vadd.f32 %v2745_v15, %v3914_v19  ;;  %v2122_v50 = vpop.f32.mrb[95].mxu0 }
 0x3be   : > { %2195 = vst.msk [vmem:[%s3919_s15 + $0x1e0] sm:$0xff] %vm2134_vm1, %v2120_v14  ;;  %v2123_v20 = vadd.f32 %v3914_v19, %v2122_v50 }
 0x3bf   : > { %2198 = vst.msk [vmem:[%s3919_s15 + $0x1f8] sm:$0xff] %vm2134_vm1, %v2131_v17 }
 0x3c0   : > { %2196 = vst.msk [vmem:[%s3919_s15 + $0x1e8] sm:$0xff] %vm2134_vm1, %v2123_v20 }
 0x3c1 PF: > { %s4156_s13 = sld [smem:[#allocation10_spill]]  ;;  %p22_p2 = scmp.ge.s32.totalorder %s3046_s14, 4  }
 0x3c2   : > { %s4157_s30 = smov %s2955_s10  ;;  %s4158_s10 = smov %s2959_s11 }
 0x3c3   : > { %s4160_s12 = smov %s3046_s14  ;;  %24 = sbr.rel (!%p22_p2) target bundleno = 8 (0x8), region = 116 }
 0x3c7   : > { %s4159_s11 = smov %s4156_s13 }
 0x3ca   :  { %2221 = vsyncpa [#allocation3], 1 }
 0x3cb   :  { %2223 = vsyncpa [#allocation3 + $0x1], 1 }
 0x3cc   :  { %2224 = vsyncpa [#allocation5], 1 }
 0x3cd   :  { %2226 = vsyncpa [#allocation5 + $0x1], 1 }

</bundles_post_ra>
